<compile_context>
chip_gen: v5e
topology: v5e:2x2
jax: 0.10.0
libtpu: 0.0.40
codegen_flags: <defaults>
</compile_context>

<pallas_src>
import math

import jax
import jax.numpy as jnp
from jax.experimental import pallas as pl
from jax.experimental.pallas import tpu as pltpu

# ----------------------------- configuration ------------------------------
B = 2            # batch
T_TXT = 8        # text sequence length
HID = 32         # args.hidden_sz (BERT hidden)
HEADS = 4
DHEAD = HID // HEADS
INTER = 64       # BERT intermediate size
LAYERS = 2       # number of BERT encoder layers
VOCAB = 100
MAXPOS = 64
TYPEVOCAB = 2
G_HID = 16       # args.g_hidden_sz (== args.img_hidden_sz after reassignment)
NUM_IMG = 1      # args.num_image_embeds  (==1 path)
N_NODES = 50     # graph node vocabulary for the SageEncoder stand-in
CLS_ID = 1       # args.vocab.stoi['[CLS]']
SEP_ID = 2       # args.vocab.stoi['[SEP]']
SEQ_IMG = NUM_IMG + 2
SEQ = SEQ_IMG + T_TXT
LN_EPS = 1e-12
ARGS_POS = True  # args.pos


# ------------------------------ fused Pallas kernel -----------------------------
def _encoder_kernel(base_ref, gpad_ref, mask_ref, img_w_ref, ln_g_ref, ln_b_ref,
                    qkv_w_ref, qkv_b_ref, ao_w_ref, ao_b_ref, ao_ln_g_ref, ao_ln_b_ref,
                    i_w_ref, i_b_ref, o_w_ref, o_b_ref, o_ln_g_ref, o_ln_b_ref,
                    pool_w_ref, pool_b_ref, out_ref):
    f32 = jnp.float32
    bf16 = jnp.bfloat16

    def ln(x, g, b):
        mu = jnp.mean(x, axis=-1, keepdims=True)
        xc = x - mu
        var = jnp.mean(xc * xc, axis=-1, keepdims=True)
        return xc * jax.lax.rsqrt(var + LN_EPS) * g + b

    def mm(x, w, b):
        # bf16 MXU inputs, f32 accumulation.
        return jnp.dot(x.astype(bf16), w, preferred_element_type=f32) + b

    # ---- embeddings: base (word/cls/sep + pos + type + img bias) + img linear, then LN ----
    x = base_ref[0] + jnp.dot(gpad_ref[0].astype(bf16), img_w_ref[...],
                              preferred_element_type=f32)
    x = ln(x, ln_g_ref[...], ln_b_ref[...])                     # (SEQ, HID)

    m = mask_ref[0]                                             # (1, SEQ) additive mask
    scale = 1.0 / math.sqrt(DHEAD)

    for li in range(LAYERS):
        # ---- fused QKV projection: one (HID, 3*HID) matmul ----
        qkv = mm(x, qkv_w_ref[li], qkv_b_ref[li])               # (SEQ, 3*HID) f32
        q = qkv[:, 0:HID]
        k = qkv[:, HID:2 * HID]
        v = qkv[:, 2 * HID:3 * HID]

        # ---- multi-head attention (all in VMEM, f32 softmax math) ----
        ctx_heads = []
        for h in range(HEADS):
            lo = h * DHEAD
            qh = q[:, lo:lo + DHEAD]                            # (SEQ, DHEAD)
            kh = k[:, lo:lo + DHEAD]
            vh = v[:, lo:lo + DHEAD]
            s = jnp.einsum("qd,kd->qk", qh, kh,
                           preferred_element_type=f32) * scale + m
            s = s - jnp.max(s, axis=-1, keepdims=True)
            p = jnp.exp(s)
            p = p * pl.reciprocal(jnp.sum(p, axis=-1, keepdims=True), approx=True)
            ctx_heads.append(jnp.dot(p, vh, preferred_element_type=f32))
        ctx = jnp.concatenate(ctx_heads, axis=-1)               # (SEQ, HID)

        # ---- attention output projection + residual + LayerNorm (fused) ----
        ao = mm(ctx, ao_w_ref[li], ao_b_ref[li])
        x = ln(ao + x, ao_ln_g_ref[li], ao_ln_b_ref[li])

        # ---- FFN: intermediate (GELU) + output + residual + LayerNorm (fused) ----
        inter = mm(x, i_w_ref[li], i_b_ref[li])
        inter = 0.5 * inter * (1.0 + jnp.tanh(
            0.7978845608028654 * (inter + 0.044715 * inter * inter * inter)))
        out = mm(inter, o_w_ref[li], o_b_ref[li])
        x = ln(out + x, o_ln_g_ref[li], o_ln_b_ref[li])

    # ---- pooler: first token -> dense -> tanh (fused; no extra launch) ----
    cls = x[0:1, :]                                             # (1, HID)
    pooled = jnp.tanh(jnp.dot(cls.astype(bf16), pool_w_ref[...],
                              preferred_element_type=f32) + pool_b_ref[...])
    out_ref[0] = pooled


# ------------------------------ parameters ---------------------------------
def _init_linear(key, fan_in, fan_out):
    kw, kb = jax.random.split(key)
    w = jax.random.normal(kw, (fan_in, fan_out), jnp.float32) * 0.02
    b = jax.random.normal(kb, (fan_out,), jnp.float32) * 0.02
    return w, b


def init_params(key):
    keys = jax.random.split(key, 8 + LAYERS)
    p = {}
    p["word_emb"] = jax.random.normal(keys[0], (VOCAB, HID), jnp.float32) * 0.02
    p["pos_emb"] = jax.random.normal(keys[1], (MAXPOS, HID), jnp.float32) * 0.02
    p["type_emb"] = jax.random.normal(keys[2], (TYPEVOCAB, HID), jnp.float32) * 0.02
    p["ln_g"] = jnp.ones((HID,), jnp.float32)
    p["ln_b"] = jnp.zeros((HID,), jnp.float32)
    p["img_w"], p["img_b"] = _init_linear(keys[3], G_HID, HID)          # ImageBertEmbeddings.img_embeddings
    p["node_emb"] = jax.random.normal(keys[4], (N_NODES, G_HID), jnp.float32) * 0.02  # SageEncoder stand-in
    p["pool_w"], p["pool_b"] = _init_linear(keys[5], HID, HID)          # bert.pooler.dense

    layers = []
    for li in range(LAYERS):
        lk = jax.random.split(keys[8 + li], 6)
        lp = {}
        lp["q_w"], lp["q_b"] = _init_linear(lk[0], HID, HID)
        lp["k_w"], lp["k_b"] = _init_linear(lk[1], HID, HID)
        lp["v_w"], lp["v_b"] = _init_linear(lk[2], HID, HID)
        lp["ao_w"], lp["ao_b"] = _init_linear(lk[3], HID, HID)
        lp["ao_ln_g"] = jnp.ones((HID,), jnp.float32)
        lp["ao_ln_b"] = jnp.zeros((HID,), jnp.float32)
        lp["i_w"], lp["i_b"] = _init_linear(lk[4], HID, INTER)
        lp["o_w"], lp["o_b"] = _init_linear(lk[5], INTER, HID)
        lp["o_ln_g"] = jnp.ones((HID,), jnp.float32)
        lp["o_ln_b"] = jnp.zeros((HID,), jnp.float32)
        layers.append(lp)
    p["layers"] = layers
    return p


# ------------------------------ model forward -------------------------------
def forward(params, input_txt, attention_mask, segment, input_img, nid):
    del input_img  # unused by the reference forward (img_encoder never called)
    bsz = input_txt.shape[0]
    bf16 = jnp.bfloat16

    # attention_mask = cat([ones(B, num_image_embeds+2), attention_mask], 1)
    full_mask = jnp.concatenate(
        [jnp.ones((bsz, SEQ_IMG), jnp.int32), attention_mask.astype(jnp.int32)], axis=1)
    ext_mask = ((1.0 - full_mask.astype(jnp.float32)) * -10000.0).reshape(bsz, 1, SEQ)

    # gembed = self.genc(nid)  -> SageEncoder stand-in (embedding lookup)
    gembed = jnp.take(params["node_emb"], nid, axis=0)                  # (B, G_HID)
    # zero-padded slab: image positions carry gembed, everything else 0
    gpad = jnp.zeros((bsz, SEQ, G_HID), jnp.float32)
    gpad = gpad.at[:, 1:1 + NUM_IMG, :].set(gembed[:, None, :])

    # ---- pre-LayerNorm embedding sum (gathers in XLA; img linear done in-kernel) ----
    cls_w = params["word_emb"][CLS_ID]
    sep_w = params["word_emb"][SEP_ID]
    tok_img = jnp.zeros((SEQ_IMG, HID), jnp.float32)
    tok_img = tok_img.at[0].set(cls_w).at[NUM_IMG + 1].set(sep_w)
    tok_img = tok_img.at[1:1 + NUM_IMG].add(params["img_b"])           # fold img bias in
    pos_img = params["pos_emb"][:SEQ_IMG]
    typ_img = params["type_emb"][jnp.zeros((bsz, SEQ_IMG), jnp.int32)]
    img_base = tok_img[None] + typ_img + (pos_img[None] if ARGS_POS else 0.0)

    word = jnp.take(params["word_emb"], input_txt, axis=0)
    pos_txt = params["pos_emb"][:T_TXT][None]
    typ_txt = jnp.take(params["type_emb"], segment, axis=0)
    txt_base = word + pos_txt + typ_txt

    base = jnp.concatenate([img_base, txt_base], axis=1)                # (B, SEQ, HID)

    # ---- stack per-layer weights; matmul weights cast to bf16 (f32 accumulation) ----
    L = params["layers"]
    qkv_w = jnp.stack([jnp.concatenate([lp["q_w"], lp["k_w"], lp["v_w"]], axis=1)
                       for lp in L]).astype(bf16)                       # (L, HID, 3*HID)
    qkv_b = jnp.stack([jnp.concatenate([lp["q_b"], lp["k_b"], lp["v_b"]])[None, :]
                       for lp in L])                                    # (L, 1, 3*HID)
    ao_w = jnp.stack([lp["ao_w"] for lp in L]).astype(bf16)
    ao_b = jnp.stack([lp["ao_b"][None, :] for lp in L])
    ao_ln_g = jnp.stack([lp["ao_ln_g"][None, :] for lp in L])
    ao_ln_b = jnp.stack([lp["ao_ln_b"][None, :] for lp in L])
    i_w = jnp.stack([lp["i_w"] for lp in L]).astype(bf16)
    i_b = jnp.stack([lp["i_b"][None, :] for lp in L])
    o_w = jnp.stack([lp["o_w"] for lp in L]).astype(bf16)
    o_b = jnp.stack([lp["o_b"][None, :] for lp in L])
    o_ln_g = jnp.stack([lp["o_ln_g"][None, :] for lp in L])
    o_ln_b = jnp.stack([lp["o_ln_b"][None, :] for lp in L])

    # ---- single fused pallas_call: grid over batch (parallel -> 2 TCs on v7x) ----
    w3 = lambda b: (0, 0, 0)
    w2 = lambda b: (0, 0)
    pooled = pl.pallas_call(
        _encoder_kernel,
        out_shape=jax.ShapeDtypeStruct((bsz, 1, HID), jnp.float32),
        grid=(bsz,),
        in_specs=[
            pl.BlockSpec((1, SEQ, HID), lambda b: (b, 0, 0)),       # base embeddings
            pl.BlockSpec((1, SEQ, G_HID), lambda b: (b, 0, 0)),     # padded gembed
            pl.BlockSpec((1, 1, SEQ), lambda b: (b, 0, 0)),         # additive attention mask
            pl.BlockSpec((G_HID, HID), w2),                         # img_w (bf16)
            pl.BlockSpec((1, HID), w2),                             # emb LN gamma
            pl.BlockSpec((1, HID), w2),                             # emb LN beta
            pl.BlockSpec((LAYERS, HID, 3 * HID), w3),               # fused QKV weight (bf16)
            pl.BlockSpec((LAYERS, 1, 3 * HID), w3),                 # fused QKV bias
            pl.BlockSpec((LAYERS, HID, HID), w3),                   # attn output weight (bf16)
            pl.BlockSpec((LAYERS, 1, HID), w3),                     # attn output bias
            pl.BlockSpec((LAYERS, 1, HID), w3),                     # attn LN gamma
            pl.BlockSpec((LAYERS, 1, HID), w3),                     # attn LN beta
            pl.BlockSpec((LAYERS, HID, INTER), w3),                 # FFN intermediate weight (bf16)
            pl.BlockSpec((LAYERS, 1, INTER), w3),                   # FFN intermediate bias
            pl.BlockSpec((LAYERS, INTER, HID), w3),                 # FFN output weight (bf16)
            pl.BlockSpec((LAYERS, 1, HID), w3),                     # FFN output bias
            pl.BlockSpec((LAYERS, 1, HID), w3),                     # FFN LN gamma
            pl.BlockSpec((LAYERS, 1, HID), w3),                     # FFN LN beta
            pl.BlockSpec((HID, HID), w2),                           # pooler weight (bf16)
            pl.BlockSpec((1, HID), w2),                             # pooler bias
        ],
        out_specs=pl.BlockSpec((1, 1, HID), lambda b: (b, 0, 0)),
        compiler_params=pltpu.CompilerParams(dimension_semantics=("parallel",)),
    )(base, gpad, ext_mask,
      params["img_w"].astype(bf16),
      params["ln_g"].reshape(1, HID), params["ln_b"].reshape(1, HID),
      qkv_w, qkv_b, ao_w, ao_b, ao_ln_g, ao_ln_b,
      i_w, i_b, o_w, o_b, o_ln_g, o_ln_b,
      params["pool_w"].astype(bf16), params["pool_b"].reshape(1, HID))

    return pooled.reshape(bsz, HID)


# ----------------------------------- main -----------------------------------
if __name__ == "__main__":
    params = init_params(jax.random.PRNGKey(0))

    k1, k2, k3, k4 = jax.random.split(jax.random.PRNGKey(0), 4)
    input_txt = jax.random.randint(k1, (B, T_TXT), 0, VOCAB, dtype=jnp.int32)
    attention_mask = jnp.ones((B, T_TXT), jnp.int32).at[:, -2:].set(0)  # some padding
    segment = jnp.zeros((B, T_TXT), jnp.int32)
    input_img = jax.random.normal(k3, (B, 3, 16, 16), jnp.float32)      # present but unused (as in reference)
    nid = jax.random.randint(k4, (B,), 0, N_NODES, dtype=jnp.int32)

    fwd = jax.jit(forward)
    out = fwd(params, input_txt, attention_mask, segment, input_img, nid)
    jax.block_until_ready(out)
    assert out.shape == (B, HID) and out.dtype == jnp.float32
    print("KERNEL_OK")
</pallas_src>

<mosaic_0001>
module attributes {stable_mosaic.version = 11 : i64} {
  func.func @_encoder_kernel(%arg0: i32, %arg1: memref<1x11x32xf32, #tpu.memory_space<vmem>>, %arg2: memref<1x11x16xf32, #tpu.memory_space<vmem>>, %arg3: memref<1x1x11xf32, #tpu.memory_space<vmem>>, %arg4: memref<16x32xbf16, #tpu.memory_space<vmem>>, %arg5: memref<1x32xf32, #tpu.memory_space<vmem>>, %arg6: memref<1x32xf32, #tpu.memory_space<vmem>>, %arg7: memref<2x32x96xbf16, #tpu.memory_space<vmem>>, %arg8: memref<2x1x96xf32, #tpu.memory_space<vmem>>, %arg9: memref<2x32x32xbf16, #tpu.memory_space<vmem>>, %arg10: memref<2x1x32xf32, #tpu.memory_space<vmem>>, %arg11: memref<2x1x32xf32, #tpu.memory_space<vmem>>, %arg12: memref<2x1x32xf32, #tpu.memory_space<vmem>>, %arg13: memref<2x32x64xbf16, #tpu.memory_space<vmem>>, %arg14: memref<2x1x64xf32, #tpu.memory_space<vmem>>, %arg15: memref<2x64x32xbf16, #tpu.memory_space<vmem>>, %arg16: memref<2x1x32xf32, #tpu.memory_space<vmem>>, %arg17: memref<2x1x32xf32, #tpu.memory_space<vmem>>, %arg18: memref<2x1x32xf32, #tpu.memory_space<vmem>>, %arg19: memref<32x32xbf16, #tpu.memory_space<vmem>>, %arg20: memref<1x32xf32, #tpu.memory_space<vmem>>, %arg21: memref<1x1x32xf32, #tpu.memory_space<vmem>>) attributes {dimension_semantics = [#tpu.dimension_semantics<parallel>], iteration_bounds = array<i64: 2>, scalar_prefetch = 0 : i64, scratch_operands = 0 : i64, tpu.core_type = #tpu.core_type<tc>, window_params = [{transform_indices = @transform_0, window_bounds = array<i64: 1, 11, 32>}, {transform_indices = @transform_1, window_bounds = array<i64: 1, 11, 16>}, {transform_indices = @transform_2, window_bounds = array<i64: 1, 1, 11>}, {pipeline_mode = #tpu.pipeline_mode<synchronous>, transform_indices = @transform_3, window_bounds = array<i64: 16, 32>}, {pipeline_mode = #tpu.pipeline_mode<synchronous>, transform_indices = @transform_4, window_bounds = array<i64: 1, 32>}, {pipeline_mode = #tpu.pipeline_mode<synchronous>, transform_indices = @transform_5, window_bounds = array<i64: 1, 32>}, {pipeline_mode = #tpu.pipeline_mode<synchronous>, transform_indices = @transform_6, window_bounds = array<i64: 2, 32, 96>}, {pipeline_mode = #tpu.pipeline_mode<synchronous>, transform_indices = @transform_7, window_bounds = array<i64: 2, 1, 96>}, {pipeline_mode = #tpu.pipeline_mode<synchronous>, transform_indices = @transform_8, window_bounds = array<i64: 2, 32, 32>}, {pipeline_mode = #tpu.pipeline_mode<synchronous>, transform_indices = @transform_9, window_bounds = array<i64: 2, 1, 32>}, {pipeline_mode = #tpu.pipeline_mode<synchronous>, transform_indices = @transform_10, window_bounds = array<i64: 2, 1, 32>}, {pipeline_mode = #tpu.pipeline_mode<synchronous>, transform_indices = @transform_11, window_bounds = array<i64: 2, 1, 32>}, {pipeline_mode = #tpu.pipeline_mode<synchronous>, transform_indices = @transform_12, window_bounds = array<i64: 2, 32, 64>}, {pipeline_mode = #tpu.pipeline_mode<synchronous>, transform_indices = @transform_13, window_bounds = array<i64: 2, 1, 64>}, {pipeline_mode = #tpu.pipeline_mode<synchronous>, transform_indices = @transform_14, window_bounds = array<i64: 2, 64, 32>}, {pipeline_mode = #tpu.pipeline_mode<synchronous>, transform_indices = @transform_15, window_bounds = array<i64: 2, 1, 32>}, {pipeline_mode = #tpu.pipeline_mode<synchronous>, transform_indices = @transform_16, window_bounds = array<i64: 2, 1, 32>}, {pipeline_mode = #tpu.pipeline_mode<synchronous>, transform_indices = @transform_17, window_bounds = array<i64: 2, 1, 32>}, {pipeline_mode = #tpu.pipeline_mode<synchronous>, transform_indices = @transform_18, window_bounds = array<i64: 32, 32>}, {pipeline_mode = #tpu.pipeline_mode<synchronous>, transform_indices = @transform_19, window_bounds = array<i64: 1, 32>}, {transform_indices = @transform_20, window_bounds = array<i64: 1, 1, 32>}]} {
    %c0 = arith.constant 0 : index
    %c0_0 = arith.constant 0 : index
    %c0_1 = arith.constant 0 : index
    %0 = vector.load %arg1[%c0, %c0_0, %c0_1] : memref<1x11x32xf32, #tpu.memory_space<vmem>>, vector<1x11x32xf32>
    %1 = vector.shape_cast %0 : vector<1x11x32xf32> to vector<11x32xf32>
    %c0_2 = arith.constant 0 : index
    %c0_3 = arith.constant 0 : index
    %c0_4 = arith.constant 0 : index
    %2 = vector.load %arg2[%c0_2, %c0_3, %c0_4] : memref<1x11x16xf32, #tpu.memory_space<vmem>>, vector<1x11x16xf32>
    %3 = vector.shape_cast %2 : vector<1x11x16xf32> to vector<11x16xf32>
    %4 = arith.truncf %3 : vector<11x16xf32> to vector<11x16xbf16>
    %c0_5 = arith.constant 0 : index
    %c0_6 = arith.constant 0 : index
    %5 = vector.load %arg4[%c0_5, %c0_6] : memref<16x32xbf16, #tpu.memory_space<vmem>>, vector<16x32xbf16>
    %cst = arith.constant dense<0.000000e+00> : vector<11x32xf32>
    %6 = tpu.matmul %4, %5, %cst {dimension_numbers = #tpu.dot_dimension_numbers<[1], [0], [0], [1], [0, 0, 1, 1], [], []>} : vector<11x16xbf16>, vector<16x32xbf16>, vector<11x32xf32> -> vector<11x32xf32>
    %7 = arith.addf %1, %6 : vector<11x32xf32>
    %c0_7 = arith.constant 0 : index
    %c0_8 = arith.constant 0 : index
    %8 = vector.load %arg5[%c0_7, %c0_8] : memref<1x32xf32, #tpu.memory_space<vmem>>, vector<1x32xf32>
    %c0_9 = arith.constant 0 : index
    %c0_10 = arith.constant 0 : index
    %9 = vector.load %arg6[%c0_9, %c0_10] : memref<1x32xf32, #tpu.memory_space<vmem>>, vector<1x32xf32>
    %cst_11 = arith.constant dense<0.000000e+00> : vector<11xf32>
    %10 = vector.multi_reduction <add>, %7, %cst_11 [1] : vector<11x32xf32> to vector<11xf32>
    %11 = vector.shape_cast %10 : vector<11xf32> to vector<11x1xf32>
    %cst_12 = arith.constant 3.200000e+01 : f32
    %12 = vector.broadcast %cst_12 : f32 to vector<11x1xf32>
    %13 = arith.divf %11, %12 : vector<11x1xf32>
    %14 = vector.broadcast %13 : vector<11x1xf32> to vector<11x32xf32>
    %15 = arith.subf %7, %14 : vector<11x32xf32>
    %16 = arith.mulf %15, %15 : vector<11x32xf32>
    %cst_13 = arith.constant dense<0.000000e+00> : vector<11xf32>
    %17 = vector.multi_reduction <add>, %16, %cst_13 [1] : vector<11x32xf32> to vector<11xf32>
    %18 = vector.shape_cast %17 : vector<11xf32> to vector<11x1xf32>
    %cst_14 = arith.constant 3.200000e+01 : f32
    %19 = vector.broadcast %cst_14 : f32 to vector<11x1xf32>
    %20 = arith.divf %18, %19 : vector<11x1xf32>
    %cst_15 = arith.constant 9.99999996E-13 : f32
    %21 = vector.broadcast %cst_15 : f32 to vector<11x1xf32>
    %22 = arith.addf %20, %21 : vector<11x1xf32>
    %23 = math.rsqrt %22 : vector<11x1xf32>
    %24 = vector.broadcast %23 : vector<11x1xf32> to vector<11x32xf32>
    %25 = arith.mulf %15, %24 : vector<11x32xf32>
    %26 = vector.broadcast %8 : vector<1x32xf32> to vector<11x32xf32>
    %27 = arith.mulf %25, %26 : vector<11x32xf32>
    %28 = vector.broadcast %9 : vector<1x32xf32> to vector<11x32xf32>
    %29 = arith.addf %27, %28 : vector<11x32xf32>
    %c0_16 = arith.constant 0 : index
    %c0_17 = arith.constant 0 : index
    %c0_18 = arith.constant 0 : index
    %30 = vector.load %arg3[%c0_16, %c0_17, %c0_18] : memref<1x1x11xf32, #tpu.memory_space<vmem>>, vector<1x1x11xf32>
    %31 = vector.shape_cast %30 : vector<1x1x11xf32> to vector<1x11xf32>
    %c0_19 = arith.constant 0 : index
    %c0_20 = arith.constant 0 : index
    %c0_21 = arith.constant 0 : index
    %32 = vector.load %arg7[%c0_19, %c0_20, %c0_21] : memref<2x32x96xbf16, #tpu.memory_space<vmem>>, vector<1x32x96xbf16>
    %33 = vector.shape_cast %32 : vector<1x32x96xbf16> to vector<32x96xbf16>
    %c0_22 = arith.constant 0 : index
    %c0_23 = arith.constant 0 : index
    %c0_24 = arith.constant 0 : index
    %34 = vector.load %arg8[%c0_22, %c0_23, %c0_24] : memref<2x1x96xf32, #tpu.memory_space<vmem>>, vector<1x1x96xf32>
    %35 = vector.shape_cast %34 : vector<1x1x96xf32> to vector<1x96xf32>
    %36 = arith.truncf %29 : vector<11x32xf32> to vector<11x32xbf16>
    %cst_25 = arith.constant dense<0.000000e+00> : vector<11x96xf32>
    %37 = tpu.matmul %36, %33, %cst_25 {dimension_numbers = #tpu.dot_dimension_numbers<[1], [0], [0], [1], [0, 0, 1, 1], [], []>} : vector<11x32xbf16>, vector<32x96xbf16>, vector<11x96xf32> -> vector<11x96xf32>
    %38 = vector.broadcast %35 : vector<1x96xf32> to vector<11x96xf32>
    %39 = arith.addf %37, %38 : vector<11x96xf32>
    %40 = vector.extract_strided_slice %39 {offsets = [0, 0], sizes = [11, 32], strides = [1, 1]} : vector<11x96xf32> to vector<11x32xf32>
    %41 = vector.extract_strided_slice %39 {offsets = [0, 32], sizes = [11, 32], strides = [1, 1]} : vector<11x96xf32> to vector<11x32xf32>
    %42 = vector.extract_strided_slice %39 {offsets = [0, 64], sizes = [11, 32], strides = [1, 1]} : vector<11x96xf32> to vector<11x32xf32>
    %43 = vector.extract_strided_slice %40 {offsets = [0, 0], sizes = [11, 8], strides = [1, 1]} : vector<11x32xf32> to vector<11x8xf32>
    %44 = vector.extract_strided_slice %41 {offsets = [0, 0], sizes = [11, 8], strides = [1, 1]} : vector<11x32xf32> to vector<11x8xf32>
    %45 = vector.extract_strided_slice %42 {offsets = [0, 0], sizes = [11, 8], strides = [1, 1]} : vector<11x32xf32> to vector<11x8xf32>
    "tpu.trace_start"() <{level = 10 : i32, message = "qd,kd->qk"}> : () -> ()
    %cst_26 = arith.constant dense<0.000000e+00> : vector<11x11xf32>
    %46 = tpu.matmul %43, %44, %cst_26 {dimension_numbers = #tpu.dot_dimension_numbers<[1], [1], [0], [0], [0, 0, 1, 0], [], []>} : vector<11x8xf32>, vector<11x8xf32>, vector<11x11xf32> -> vector<11x11xf32>
    "tpu.trace_stop"() : () -> ()
    %cst_27 = arith.constant 0.353553385 : f32
    %47 = vector.broadcast %cst_27 : f32 to vector<11x11xf32>
    %48 = arith.mulf %46, %47 : vector<11x11xf32>
    %49 = vector.broadcast %31 : vector<1x11xf32> to vector<11x11xf32>
    %50 = arith.addf %48, %49 : vector<11x11xf32>
    %cst_28 = arith.constant dense<0xFF800000> : vector<11xf32>
    %51 = vector.multi_reduction <maximumf>, %50, %cst_28 [1] : vector<11x11xf32> to vector<11xf32>
    %52 = vector.shape_cast %51 : vector<11xf32> to vector<11x1xf32>
    %53 = vector.broadcast %52 : vector<11x1xf32> to vector<11x11xf32>
    %54 = arith.subf %50, %53 : vector<11x11xf32>
    %55 = math.exp %54 : vector<11x11xf32>
    %cst_29 = arith.constant dense<0.000000e+00> : vector<11xf32>
    %56 = vector.multi_reduction <add>, %55, %cst_29 [1] : vector<11x11xf32> to vector<11xf32>
    %57 = vector.shape_cast %56 : vector<11xf32> to vector<11x1xf32>
    %58 = tpu.reciprocal %57 {approx = true} : vector<11x1xf32> -> vector<11x1xf32>
    %59 = vector.broadcast %58 : vector<11x1xf32> to vector<11x11xf32>
    %60 = arith.mulf %55, %59 : vector<11x11xf32>
    %cst_30 = arith.constant dense<0.000000e+00> : vector<11x8xf32>
    %61 = tpu.matmul %60, %45, %cst_30 {dimension_numbers = #tpu.dot_dimension_numbers<[1], [0], [0], [1], [0, 0, 1, 1], [], []>} : vector<11x11xf32>, vector<11x8xf32>, vector<11x8xf32> -> vector<11x8xf32>
    %62 = vector.extract_strided_slice %40 {offsets = [0, 8], sizes = [11, 8], strides = [1, 1]} : vector<11x32xf32> to vector<11x8xf32>
    %63 = vector.extract_strided_slice %41 {offsets = [0, 8], sizes = [11, 8], strides = [1, 1]} : vector<11x32xf32> to vector<11x8xf32>
    %64 = vector.extract_strided_slice %42 {offsets = [0, 8], sizes = [11, 8], strides = [1, 1]} : vector<11x32xf32> to vector<11x8xf32>
    "tpu.trace_start"() <{level = 10 : i32, message = "qd,kd->qk"}> : () -> ()
    %cst_31 = arith.constant dense<0.000000e+00> : vector<11x11xf32>
    %65 = tpu.matmul %62, %63, %cst_31 {dimension_numbers = #tpu.dot_dimension_numbers<[1], [1], [0], [0], [0, 0, 1, 0], [], []>} : vector<11x8xf32>, vector<11x8xf32>, vector<11x11xf32> -> vector<11x11xf32>
    "tpu.trace_stop"() : () -> ()
    %cst_32 = arith.constant 0.353553385 : f32
    %66 = vector.broadcast %cst_32 : f32 to vector<11x11xf32>
    %67 = arith.mulf %65, %66 : vector<11x11xf32>
    %68 = vector.broadcast %31 : vector<1x11xf32> to vector<11x11xf32>
    %69 = arith.addf %67, %68 : vector<11x11xf32>
    %cst_33 = arith.constant dense<0xFF800000> : vector<11xf32>
    %70 = vector.multi_reduction <maximumf>, %69, %cst_33 [1] : vector<11x11xf32> to vector<11xf32>
    %71 = vector.shape_cast %70 : vector<11xf32> to vector<11x1xf32>
    %72 = vector.broadcast %71 : vector<11x1xf32> to vector<11x11xf32>
    %73 = arith.subf %69, %72 : vector<11x11xf32>
    %74 = math.exp %73 : vector<11x11xf32>
    %cst_34 = arith.constant dense<0.000000e+00> : vector<11xf32>
    %75 = vector.multi_reduction <add>, %74, %cst_34 [1] : vector<11x11xf32> to vector<11xf32>
    %76 = vector.shape_cast %75 : vector<11xf32> to vector<11x1xf32>
    %77 = tpu.reciprocal %76 {approx = true} : vector<11x1xf32> -> vector<11x1xf32>
    %78 = vector.broadcast %77 : vector<11x1xf32> to vector<11x11xf32>
    %79 = arith.mulf %74, %78 : vector<11x11xf32>
    %cst_35 = arith.constant dense<0.000000e+00> : vector<11x8xf32>
    %80 = tpu.matmul %79, %64, %cst_35 {dimension_numbers = #tpu.dot_dimension_numbers<[1], [0], [0], [1], [0, 0, 1, 1], [], []>} : vector<11x11xf32>, vector<11x8xf32>, vector<11x8xf32> -> vector<11x8xf32>
    %81 = vector.extract_strided_slice %40 {offsets = [0, 16], sizes = [11, 8], strides = [1, 1]} : vector<11x32xf32> to vector<11x8xf32>
    %82 = vector.extract_strided_slice %41 {offsets = [0, 16], sizes = [11, 8], strides = [1, 1]} : vector<11x32xf32> to vector<11x8xf32>
    %83 = vector.extract_strided_slice %42 {offsets = [0, 16], sizes = [11, 8], strides = [1, 1]} : vector<11x32xf32> to vector<11x8xf32>
    "tpu.trace_start"() <{level = 10 : i32, message = "qd,kd->qk"}> : () -> ()
    %cst_36 = arith.constant dense<0.000000e+00> : vector<11x11xf32>
    %84 = tpu.matmul %81, %82, %cst_36 {dimension_numbers = #tpu.dot_dimension_numbers<[1], [1], [0], [0], [0, 0, 1, 0], [], []>} : vector<11x8xf32>, vector<11x8xf32>, vector<11x11xf32> -> vector<11x11xf32>
    "tpu.trace_stop"() : () -> ()
    %cst_37 = arith.constant 0.353553385 : f32
    %85 = vector.broadcast %cst_37 : f32 to vector<11x11xf32>
    %86 = arith.mulf %84, %85 : vector<11x11xf32>
    %87 = vector.broadcast %31 : vector<1x11xf32> to vector<11x11xf32>
    %88 = arith.addf %86, %87 : vector<11x11xf32>
    %cst_38 = arith.constant dense<0xFF800000> : vector<11xf32>
    %89 = vector.multi_reduction <maximumf>, %88, %cst_38 [1] : vector<11x11xf32> to vector<11xf32>
    %90 = vector.shape_cast %89 : vector<11xf32> to vector<11x1xf32>
    %91 = vector.broadcast %90 : vector<11x1xf32> to vector<11x11xf32>
    %92 = arith.subf %88, %91 : vector<11x11xf32>
    %93 = math.exp %92 : vector<11x11xf32>
    %cst_39 = arith.constant dense<0.000000e+00> : vector<11xf32>
    %94 = vector.multi_reduction <add>, %93, %cst_39 [1] : vector<11x11xf32> to vector<11xf32>
    %95 = vector.shape_cast %94 : vector<11xf32> to vector<11x1xf32>
    %96 = tpu.reciprocal %95 {approx = true} : vector<11x1xf32> -> vector<11x1xf32>
    %97 = vector.broadcast %96 : vector<11x1xf32> to vector<11x11xf32>
    %98 = arith.mulf %93, %97 : vector<11x11xf32>
    %cst_40 = arith.constant dense<0.000000e+00> : vector<11x8xf32>
    %99 = tpu.matmul %98, %83, %cst_40 {dimension_numbers = #tpu.dot_dimension_numbers<[1], [0], [0], [1], [0, 0, 1, 1], [], []>} : vector<11x11xf32>, vector<11x8xf32>, vector<11x8xf32> -> vector<11x8xf32>
    %100 = vector.extract_strided_slice %40 {offsets = [0, 24], sizes = [11, 8], strides = [1, 1]} : vector<11x32xf32> to vector<11x8xf32>
    %101 = vector.extract_strided_slice %41 {offsets = [0, 24], sizes = [11, 8], strides = [1, 1]} : vector<11x32xf32> to vector<11x8xf32>
    %102 = vector.extract_strided_slice %42 {offsets = [0, 24], sizes = [11, 8], strides = [1, 1]} : vector<11x32xf32> to vector<11x8xf32>
    "tpu.trace_start"() <{level = 10 : i32, message = "qd,kd->qk"}> : () -> ()
    %cst_41 = arith.constant dense<0.000000e+00> : vector<11x11xf32>
    %103 = tpu.matmul %100, %101, %cst_41 {dimension_numbers = #tpu.dot_dimension_numbers<[1], [1], [0], [0], [0, 0, 1, 0], [], []>} : vector<11x8xf32>, vector<11x8xf32>, vector<11x11xf32> -> vector<11x11xf32>
    "tpu.trace_stop"() : () -> ()
    %cst_42 = arith.constant 0.353553385 : f32
    %104 = vector.broadcast %cst_42 : f32 to vector<11x11xf32>
    %105 = arith.mulf %103, %104 : vector<11x11xf32>
    %106 = vector.broadcast %31 : vector<1x11xf32> to vector<11x11xf32>
    %107 = arith.addf %105, %106 : vector<11x11xf32>
    %cst_43 = arith.constant dense<0xFF800000> : vector<11xf32>
    %108 = vector.multi_reduction <maximumf>, %107, %cst_43 [1] : vector<11x11xf32> to vector<11xf32>
    %109 = vector.shape_cast %108 : vector<11xf32> to vector<11x1xf32>
    %110 = vector.broadcast %109 : vector<11x1xf32> to vector<11x11xf32>
    %111 = arith.subf %107, %110 : vector<11x11xf32>
    %112 = math.exp %111 : vector<11x11xf32>
    %cst_44 = arith.constant dense<0.000000e+00> : vector<11xf32>
    %113 = vector.multi_reduction <add>, %112, %cst_44 [1] : vector<11x11xf32> to vector<11xf32>
    %114 = vector.shape_cast %113 : vector<11xf32> to vector<11x1xf32>
    %115 = tpu.reciprocal %114 {approx = true} : vector<11x1xf32> -> vector<11x1xf32>
    %116 = vector.broadcast %115 : vector<11x1xf32> to vector<11x11xf32>
    %117 = arith.mulf %112, %116 : vector<11x11xf32>
    %cst_45 = arith.constant dense<0.000000e+00> : vector<11x8xf32>
    %118 = tpu.matmul %117, %102, %cst_45 {dimension_numbers = #tpu.dot_dimension_numbers<[1], [0], [0], [1], [0, 0, 1, 1], [], []>} : vector<11x11xf32>, vector<11x8xf32>, vector<11x8xf32> -> vector<11x8xf32>
    %119 = tpu.concatenate %61, %80, %99, %118 in 1 : vector<11x8xf32>, vector<11x8xf32>, vector<11x8xf32>, vector<11x8xf32> -> vector<11x32xf32>
    %c0_46 = arith.constant 0 : index
    %c0_47 = arith.constant 0 : index
    %c0_48 = arith.constant 0 : index
    %120 = vector.load %arg9[%c0_46, %c0_47, %c0_48] : memref<2x32x32xbf16, #tpu.memory_space<vmem>>, vector<1x32x32xbf16>
    %121 = vector.shape_cast %120 : vector<1x32x32xbf16> to vector<32x32xbf16>
    %c0_49 = arith.constant 0 : index
    %c0_50 = arith.constant 0 : index
    %c0_51 = arith.constant 0 : index
    %122 = vector.load %arg10[%c0_49, %c0_50, %c0_51] : memref<2x1x32xf32, #tpu.memory_space<vmem>>, vector<1x1x32xf32>
    %123 = vector.shape_cast %122 : vector<1x1x32xf32> to vector<1x32xf32>
    %124 = arith.truncf %119 : vector<11x32xf32> to vector<11x32xbf16>
    %cst_52 = arith.constant dense<0.000000e+00> : vector<11x32xf32>
    %125 = tpu.matmul %124, %121, %cst_52 {dimension_numbers = #tpu.dot_dimension_numbers<[1], [0], [0], [1], [0, 0, 1, 1], [], []>} : vector<11x32xbf16>, vector<32x32xbf16>, vector<11x32xf32> -> vector<11x32xf32>
    %126 = vector.broadcast %123 : vector<1x32xf32> to vector<11x32xf32>
    %127 = arith.addf %125, %126 : vector<11x32xf32>
    %128 = arith.addf %127, %29 : vector<11x32xf32>
    %c0_53 = arith.constant 0 : index
    %c0_54 = arith.constant 0 : index
    %c0_55 = arith.constant 0 : index
    %129 = vector.load %arg11[%c0_53, %c0_54, %c0_55] : memref<2x1x32xf32, #tpu.memory_space<vmem>>, vector<1x1x32xf32>
    %130 = vector.shape_cast %129 : vector<1x1x32xf32> to vector<1x32xf32>
    %c0_56 = arith.constant 0 : index
    %c0_57 = arith.constant 0 : index
    %c0_58 = arith.constant 0 : index
    %131 = vector.load %arg12[%c0_56, %c0_57, %c0_58] : memref<2x1x32xf32, #tpu.memory_space<vmem>>, vector<1x1x32xf32>
    %132 = vector.shape_cast %131 : vector<1x1x32xf32> to vector<1x32xf32>
    %cst_59 = arith.constant dense<0.000000e+00> : vector<11xf32>
    %133 = vector.multi_reduction <add>, %128, %cst_59 [1] : vector<11x32xf32> to vector<11xf32>
    %134 = vector.shape_cast %133 : vector<11xf32> to vector<11x1xf32>
    %cst_60 = arith.constant 3.200000e+01 : f32
    %135 = vector.broadcast %cst_60 : f32 to vector<11x1xf32>
    %136 = arith.divf %134, %135 : vector<11x1xf32>
    %137 = vector.broadcast %136 : vector<11x1xf32> to vector<11x32xf32>
    %138 = arith.subf %128, %137 : vector<11x32xf32>
    %139 = arith.mulf %138, %138 : vector<11x32xf32>
    %cst_61 = arith.constant dense<0.000000e+00> : vector<11xf32>
    %140 = vector.multi_reduction <add>, %139, %cst_61 [1] : vector<11x32xf32> to vector<11xf32>
    %141 = vector.shape_cast %140 : vector<11xf32> to vector<11x1xf32>
    %cst_62 = arith.constant 3.200000e+01 : f32
    %142 = vector.broadcast %cst_62 : f32 to vector<11x1xf32>
    %143 = arith.divf %141, %142 : vector<11x1xf32>
    %cst_63 = arith.constant 9.99999996E-13 : f32
    %144 = vector.broadcast %cst_63 : f32 to vector<11x1xf32>
    %145 = arith.addf %143, %144 : vector<11x1xf32>
    %146 = math.rsqrt %145 : vector<11x1xf32>
    %147 = vector.broadcast %146 : vector<11x1xf32> to vector<11x32xf32>
    %148 = arith.mulf %138, %147 : vector<11x32xf32>
    %149 = vector.broadcast %130 : vector<1x32xf32> to vector<11x32xf32>
    %150 = arith.mulf %148, %149 : vector<11x32xf32>
    %151 = vector.broadcast %132 : vector<1x32xf32> to vector<11x32xf32>
    %152 = arith.addf %150, %151 : vector<11x32xf32>
    %c0_64 = arith.constant 0 : index
    %c0_65 = arith.constant 0 : index
    %c0_66 = arith.constant 0 : index
    %153 = vector.load %arg13[%c0_64, %c0_65, %c0_66] : memref<2x32x64xbf16, #tpu.memory_space<vmem>>, vector<1x32x64xbf16>
    %154 = vector.shape_cast %153 : vector<1x32x64xbf16> to vector<32x64xbf16>
    %c0_67 = arith.constant 0 : index
    %c0_68 = arith.constant 0 : index
    %c0_69 = arith.constant 0 : index
    %155 = vector.load %arg14[%c0_67, %c0_68, %c0_69] : memref<2x1x64xf32, #tpu.memory_space<vmem>>, vector<1x1x64xf32>
    %156 = vector.shape_cast %155 : vector<1x1x64xf32> to vector<1x64xf32>
    %157 = arith.truncf %152 : vector<11x32xf32> to vector<11x32xbf16>
    %cst_70 = arith.constant dense<0.000000e+00> : vector<11x64xf32>
    %158 = tpu.matmul %157, %154, %cst_70 {dimension_numbers = #tpu.dot_dimension_numbers<[1], [0], [0], [1], [0, 0, 1, 1], [], []>} : vector<11x32xbf16>, vector<32x64xbf16>, vector<11x64xf32> -> vector<11x64xf32>
    %159 = vector.broadcast %156 : vector<1x64xf32> to vector<11x64xf32>
    %160 = arith.addf %158, %159 : vector<11x64xf32>
    %cst_71 = arith.constant 5.000000e-01 : f32
    %161 = vector.broadcast %cst_71 : f32 to vector<11x64xf32>
    %162 = arith.mulf %161, %160 : vector<11x64xf32>
    %cst_72 = arith.constant 4.471500e-02 : f32
    %163 = vector.broadcast %cst_72 : f32 to vector<11x64xf32>
    %164 = arith.mulf %163, %160 : vector<11x64xf32>
    %165 = arith.mulf %164, %160 : vector<11x64xf32>
    %166 = arith.mulf %165, %160 : vector<11x64xf32>
    %167 = arith.addf %160, %166 : vector<11x64xf32>
    %cst_73 = arith.constant 0.797884583 : f32
    %168 = vector.broadcast %cst_73 : f32 to vector<11x64xf32>
    %169 = arith.mulf %168, %167 : vector<11x64xf32>
    %170 = math.tanh %169 : vector<11x64xf32>
    %cst_74 = arith.constant 1.000000e+00 : f32
    %171 = vector.broadcast %cst_74 : f32 to vector<11x64xf32>
    %172 = arith.addf %171, %170 : vector<11x64xf32>
    %173 = arith.mulf %162, %172 : vector<11x64xf32>
    %c0_75 = arith.constant 0 : index
    %c0_76 = arith.constant 0 : index
    %c0_77 = arith.constant 0 : index
    %174 = vector.load %arg15[%c0_75, %c0_76, %c0_77] : memref<2x64x32xbf16, #tpu.memory_space<vmem>>, vector<1x64x32xbf16>
    %175 = vector.shape_cast %174 : vector<1x64x32xbf16> to vector<64x32xbf16>
    %c0_78 = arith.constant 0 : index
    %c0_79 = arith.constant 0 : index
    %c0_80 = arith.constant 0 : index
    %176 = vector.load %arg16[%c0_78, %c0_79, %c0_80] : memref<2x1x32xf32, #tpu.memory_space<vmem>>, vector<1x1x32xf32>
    %177 = vector.shape_cast %176 : vector<1x1x32xf32> to vector<1x32xf32>
    %178 = arith.truncf %173 : vector<11x64xf32> to vector<11x64xbf16>
    %cst_81 = arith.constant dense<0.000000e+00> : vector<11x32xf32>
    %179 = tpu.matmul %178, %175, %cst_81 {dimension_numbers = #tpu.dot_dimension_numbers<[1], [0], [0], [1], [0, 0, 1, 1], [], []>} : vector<11x64xbf16>, vector<64x32xbf16>, vector<11x32xf32> -> vector<11x32xf32>
    %180 = vector.broadcast %177 : vector<1x32xf32> to vector<11x32xf32>
    %181 = arith.addf %179, %180 : vector<11x32xf32>
    %182 = arith.addf %181, %152 : vector<11x32xf32>
    %c0_82 = arith.constant 0 : index
    %c0_83 = arith.constant 0 : index
    %c0_84 = arith.constant 0 : index
    %183 = vector.load %arg17[%c0_82, %c0_83, %c0_84] : memref<2x1x32xf32, #tpu.memory_space<vmem>>, vector<1x1x32xf32>
    %184 = vector.shape_cast %183 : vector<1x1x32xf32> to vector<1x32xf32>
    %c0_85 = arith.constant 0 : index
    %c0_86 = arith.constant 0 : index
    %c0_87 = arith.constant 0 : index
    %185 = vector.load %arg18[%c0_85, %c0_86, %c0_87] : memref<2x1x32xf32, #tpu.memory_space<vmem>>, vector<1x1x32xf32>
    %186 = vector.shape_cast %185 : vector<1x1x32xf32> to vector<1x32xf32>
    %cst_88 = arith.constant dense<0.000000e+00> : vector<11xf32>
    %187 = vector.multi_reduction <add>, %182, %cst_88 [1] : vector<11x32xf32> to vector<11xf32>
    %188 = vector.shape_cast %187 : vector<11xf32> to vector<11x1xf32>
    %cst_89 = arith.constant 3.200000e+01 : f32
    %189 = vector.broadcast %cst_89 : f32 to vector<11x1xf32>
    %190 = arith.divf %188, %189 : vector<11x1xf32>
    %191 = vector.broadcast %190 : vector<11x1xf32> to vector<11x32xf32>
    %192 = arith.subf %182, %191 : vector<11x32xf32>
    %193 = arith.mulf %192, %192 : vector<11x32xf32>
    %cst_90 = arith.constant dense<0.000000e+00> : vector<11xf32>
    %194 = vector.multi_reduction <add>, %193, %cst_90 [1] : vector<11x32xf32> to vector<11xf32>
    %195 = vector.shape_cast %194 : vector<11xf32> to vector<11x1xf32>
    %cst_91 = arith.constant 3.200000e+01 : f32
    %196 = vector.broadcast %cst_91 : f32 to vector<11x1xf32>
    %197 = arith.divf %195, %196 : vector<11x1xf32>
    %cst_92 = arith.constant 9.99999996E-13 : f32
    %198 = vector.broadcast %cst_92 : f32 to vector<11x1xf32>
    %199 = arith.addf %197, %198 : vector<11x1xf32>
    %200 = math.rsqrt %199 : vector<11x1xf32>
    %201 = vector.broadcast %200 : vector<11x1xf32> to vector<11x32xf32>
    %202 = arith.mulf %192, %201 : vector<11x32xf32>
    %203 = vector.broadcast %184 : vector<1x32xf32> to vector<11x32xf32>
    %204 = arith.mulf %202, %203 : vector<11x32xf32>
    %205 = vector.broadcast %186 : vector<1x32xf32> to vector<11x32xf32>
    %206 = arith.addf %204, %205 : vector<11x32xf32>
    %c1 = arith.constant 1 : index
    %c0_93 = arith.constant 0 : index
    %c0_94 = arith.constant 0 : index
    %207 = vector.load %arg7[%c1, %c0_93, %c0_94] : memref<2x32x96xbf16, #tpu.memory_space<vmem>>, vector<1x32x96xbf16>
    %208 = vector.shape_cast %207 : vector<1x32x96xbf16> to vector<32x96xbf16>
    %c1_95 = arith.constant 1 : index
    %c0_96 = arith.constant 0 : index
    %c0_97 = arith.constant 0 : index
    %209 = vector.load %arg8[%c1_95, %c0_96, %c0_97] : memref<2x1x96xf32, #tpu.memory_space<vmem>>, vector<1x1x96xf32>
    %210 = vector.shape_cast %209 : vector<1x1x96xf32> to vector<1x96xf32>
    %211 = arith.truncf %206 : vector<11x32xf32> to vector<11x32xbf16>
    %cst_98 = arith.constant dense<0.000000e+00> : vector<11x96xf32>
    %212 = tpu.matmul %211, %208, %cst_98 {dimension_numbers = #tpu.dot_dimension_numbers<[1], [0], [0], [1], [0, 0, 1, 1], [], []>} : vector<11x32xbf16>, vector<32x96xbf16>, vector<11x96xf32> -> vector<11x96xf32>
    %213 = vector.broadcast %210 : vector<1x96xf32> to vector<11x96xf32>
    %214 = arith.addf %212, %213 : vector<11x96xf32>
    %215 = vector.extract_strided_slice %214 {offsets = [0, 0], sizes = [11, 32], strides = [1, 1]} : vector<11x96xf32> to vector<11x32xf32>
    %216 = vector.extract_strided_slice %214 {offsets = [0, 32], sizes = [11, 32], strides = [1, 1]} : vector<11x96xf32> to vector<11x32xf32>
    %217 = vector.extract_strided_slice %214 {offsets = [0, 64], sizes = [11, 32], strides = [1, 1]} : vector<11x96xf32> to vector<11x32xf32>
    %218 = vector.extract_strided_slice %215 {offsets = [0, 0], sizes = [11, 8], strides = [1, 1]} : vector<11x32xf32> to vector<11x8xf32>
    %219 = vector.extract_strided_slice %216 {offsets = [0, 0], sizes = [11, 8], strides = [1, 1]} : vector<11x32xf32> to vector<11x8xf32>
    %220 = vector.extract_strided_slice %217 {offsets = [0, 0], sizes = [11, 8], strides = [1, 1]} : vector<11x32xf32> to vector<11x8xf32>
    "tpu.trace_start"() <{level = 10 : i32, message = "qd,kd->qk"}> : () -> ()
    %cst_99 = arith.constant dense<0.000000e+00> : vector<11x11xf32>
    %221 = tpu.matmul %218, %219, %cst_99 {dimension_numbers = #tpu.dot_dimension_numbers<[1], [1], [0], [0], [0, 0, 1, 0], [], []>} : vector<11x8xf32>, vector<11x8xf32>, vector<11x11xf32> -> vector<11x11xf32>
    "tpu.trace_stop"() : () -> ()
    %cst_100 = arith.constant 0.353553385 : f32
    %222 = vector.broadcast %cst_100 : f32 to vector<11x11xf32>
    %223 = arith.mulf %221, %222 : vector<11x11xf32>
    %224 = vector.broadcast %31 : vector<1x11xf32> to vector<11x11xf32>
    %225 = arith.addf %223, %224 : vector<11x11xf32>
    %cst_101 = arith.constant dense<0xFF800000> : vector<11xf32>
    %226 = vector.multi_reduction <maximumf>, %225, %cst_101 [1] : vector<11x11xf32> to vector<11xf32>
    %227 = vector.shape_cast %226 : vector<11xf32> to vector<11x1xf32>
    %228 = vector.broadcast %227 : vector<11x1xf32> to vector<11x11xf32>
    %229 = arith.subf %225, %228 : vector<11x11xf32>
    %230 = math.exp %229 : vector<11x11xf32>
    %cst_102 = arith.constant dense<0.000000e+00> : vector<11xf32>
    %231 = vector.multi_reduction <add>, %230, %cst_102 [1] : vector<11x11xf32> to vector<11xf32>
    %232 = vector.shape_cast %231 : vector<11xf32> to vector<11x1xf32>
    %233 = tpu.reciprocal %232 {approx = true} : vector<11x1xf32> -> vector<11x1xf32>
    %234 = vector.broadcast %233 : vector<11x1xf32> to vector<11x11xf32>
    %235 = arith.mulf %230, %234 : vector<11x11xf32>
    %cst_103 = arith.constant dense<0.000000e+00> : vector<11x8xf32>
    %236 = tpu.matmul %235, %220, %cst_103 {dimension_numbers = #tpu.dot_dimension_numbers<[1], [0], [0], [1], [0, 0, 1, 1], [], []>} : vector<11x11xf32>, vector<11x8xf32>, vector<11x8xf32> -> vector<11x8xf32>
    %237 = vector.extract_strided_slice %215 {offsets = [0, 8], sizes = [11, 8], strides = [1, 1]} : vector<11x32xf32> to vector<11x8xf32>
    %238 = vector.extract_strided_slice %216 {offsets = [0, 8], sizes = [11, 8], strides = [1, 1]} : vector<11x32xf32> to vector<11x8xf32>
    %239 = vector.extract_strided_slice %217 {offsets = [0, 8], sizes = [11, 8], strides = [1, 1]} : vector<11x32xf32> to vector<11x8xf32>
    "tpu.trace_start"() <{level = 10 : i32, message = "qd,kd->qk"}> : () -> ()
    %cst_104 = arith.constant dense<0.000000e+00> : vector<11x11xf32>
    %240 = tpu.matmul %237, %238, %cst_104 {dimension_numbers = #tpu.dot_dimension_numbers<[1], [1], [0], [0], [0, 0, 1, 0], [], []>} : vector<11x8xf32>, vector<11x8xf32>, vector<11x11xf32> -> vector<11x11xf32>
    "tpu.trace_stop"() : () -> ()
    %cst_105 = arith.constant 0.353553385 : f32
    %241 = vector.broadcast %cst_105 : f32 to vector<11x11xf32>
    %242 = arith.mulf %240, %241 : vector<11x11xf32>
    %243 = vector.broadcast %31 : vector<1x11xf32> to vector<11x11xf32>
    %244 = arith.addf %242, %243 : vector<11x11xf32>
    %cst_106 = arith.constant dense<0xFF800000> : vector<11xf32>
    %245 = vector.multi_reduction <maximumf>, %244, %cst_106 [1] : vector<11x11xf32> to vector<11xf32>
    %246 = vector.shape_cast %245 : vector<11xf32> to vector<11x1xf32>
    %247 = vector.broadcast %246 : vector<11x1xf32> to vector<11x11xf32>
    %248 = arith.subf %244, %247 : vector<11x11xf32>
    %249 = math.exp %248 : vector<11x11xf32>
    %cst_107 = arith.constant dense<0.000000e+00> : vector<11xf32>
    %250 = vector.multi_reduction <add>, %249, %cst_107 [1] : vector<11x11xf32> to vector<11xf32>
    %251 = vector.shape_cast %250 : vector<11xf32> to vector<11x1xf32>
    %252 = tpu.reciprocal %251 {approx = true} : vector<11x1xf32> -> vector<11x1xf32>
    %253 = vector.broadcast %252 : vector<11x1xf32> to vector<11x11xf32>
    %254 = arith.mulf %249, %253 : vector<11x11xf32>
    %cst_108 = arith.constant dense<0.000000e+00> : vector<11x8xf32>
    %255 = tpu.matmul %254, %239, %cst_108 {dimension_numbers = #tpu.dot_dimension_numbers<[1], [0], [0], [1], [0, 0, 1, 1], [], []>} : vector<11x11xf32>, vector<11x8xf32>, vector<11x8xf32> -> vector<11x8xf32>
    %256 = vector.extract_strided_slice %215 {offsets = [0, 16], sizes = [11, 8], strides = [1, 1]} : vector<11x32xf32> to vector<11x8xf32>
    %257 = vector.extract_strided_slice %216 {offsets = [0, 16], sizes = [11, 8], strides = [1, 1]} : vector<11x32xf32> to vector<11x8xf32>
    %258 = vector.extract_strided_slice %217 {offsets = [0, 16], sizes = [11, 8], strides = [1, 1]} : vector<11x32xf32> to vector<11x8xf32>
    "tpu.trace_start"() <{level = 10 : i32, message = "qd,kd->qk"}> : () -> ()
    %cst_109 = arith.constant dense<0.000000e+00> : vector<11x11xf32>
    %259 = tpu.matmul %256, %257, %cst_109 {dimension_numbers = #tpu.dot_dimension_numbers<[1], [1], [0], [0], [0, 0, 1, 0], [], []>} : vector<11x8xf32>, vector<11x8xf32>, vector<11x11xf32> -> vector<11x11xf32>
    "tpu.trace_stop"() : () -> ()
    %cst_110 = arith.constant 0.353553385 : f32
    %260 = vector.broadcast %cst_110 : f32 to vector<11x11xf32>
    %261 = arith.mulf %259, %260 : vector<11x11xf32>
    %262 = vector.broadcast %31 : vector<1x11xf32> to vector<11x11xf32>
    %263 = arith.addf %261, %262 : vector<11x11xf32>
    %cst_111 = arith.constant dense<0xFF800000> : vector<11xf32>
    %264 = vector.multi_reduction <maximumf>, %263, %cst_111 [1] : vector<11x11xf32> to vector<11xf32>
    %265 = vector.shape_cast %264 : vector<11xf32> to vector<11x1xf32>
    %266 = vector.broadcast %265 : vector<11x1xf32> to vector<11x11xf32>
    %267 = arith.subf %263, %266 : vector<11x11xf32>
    %268 = math.exp %267 : vector<11x11xf32>
    %cst_112 = arith.constant dense<0.000000e+00> : vector<11xf32>
    %269 = vector.multi_reduction <add>, %268, %cst_112 [1] : vector<11x11xf32> to vector<11xf32>
    %270 = vector.shape_cast %269 : vector<11xf32> to vector<11x1xf32>
    %271 = tpu.reciprocal %270 {approx = true} : vector<11x1xf32> -> vector<11x1xf32>
    %272 = vector.broadcast %271 : vector<11x1xf32> to vector<11x11xf32>
    %273 = arith.mulf %268, %272 : vector<11x11xf32>
    %cst_113 = arith.constant dense<0.000000e+00> : vector<11x8xf32>
    %274 = tpu.matmul %273, %258, %cst_113 {dimension_numbers = #tpu.dot_dimension_numbers<[1], [0], [0], [1], [0, 0, 1, 1], [], []>} : vector<11x11xf32>, vector<11x8xf32>, vector<11x8xf32> -> vector<11x8xf32>
    %275 = vector.extract_strided_slice %215 {offsets = [0, 24], sizes = [11, 8], strides = [1, 1]} : vector<11x32xf32> to vector<11x8xf32>
    %276 = vector.extract_strided_slice %216 {offsets = [0, 24], sizes = [11, 8], strides = [1, 1]} : vector<11x32xf32> to vector<11x8xf32>
    %277 = vector.extract_strided_slice %217 {offsets = [0, 24], sizes = [11, 8], strides = [1, 1]} : vector<11x32xf32> to vector<11x8xf32>
    "tpu.trace_start"() <{level = 10 : i32, message = "qd,kd->qk"}> : () -> ()
    %cst_114 = arith.constant dense<0.000000e+00> : vector<11x11xf32>
    %278 = tpu.matmul %275, %276, %cst_114 {dimension_numbers = #tpu.dot_dimension_numbers<[1], [1], [0], [0], [0, 0, 1, 0], [], []>} : vector<11x8xf32>, vector<11x8xf32>, vector<11x11xf32> -> vector<11x11xf32>
    "tpu.trace_stop"() : () -> ()
    %cst_115 = arith.constant 0.353553385 : f32
    %279 = vector.broadcast %cst_115 : f32 to vector<11x11xf32>
    %280 = arith.mulf %278, %279 : vector<11x11xf32>
    %281 = vector.broadcast %31 : vector<1x11xf32> to vector<11x11xf32>
    %282 = arith.addf %280, %281 : vector<11x11xf32>
    %cst_116 = arith.constant dense<0xFF800000> : vector<11xf32>
    %283 = vector.multi_reduction <maximumf>, %282, %cst_116 [1] : vector<11x11xf32> to vector<11xf32>
    %284 = vector.shape_cast %283 : vector<11xf32> to vector<11x1xf32>
    %285 = vector.broadcast %284 : vector<11x1xf32> to vector<11x11xf32>
    %286 = arith.subf %282, %285 : vector<11x11xf32>
    %287 = math.exp %286 : vector<11x11xf32>
    %cst_117 = arith.constant dense<0.000000e+00> : vector<11xf32>
    %288 = vector.multi_reduction <add>, %287, %cst_117 [1] : vector<11x11xf32> to vector<11xf32>
    %289 = vector.shape_cast %288 : vector<11xf32> to vector<11x1xf32>
    %290 = tpu.reciprocal %289 {approx = true} : vector<11x1xf32> -> vector<11x1xf32>
    %291 = vector.broadcast %290 : vector<11x1xf32> to vector<11x11xf32>
    %292 = arith.mulf %287, %291 : vector<11x11xf32>
    %cst_118 = arith.constant dense<0.000000e+00> : vector<11x8xf32>
    %293 = tpu.matmul %292, %277, %cst_118 {dimension_numbers = #tpu.dot_dimension_numbers<[1], [0], [0], [1], [0, 0, 1, 1], [], []>} : vector<11x11xf32>, vector<11x8xf32>, vector<11x8xf32> -> vector<11x8xf32>
    %294 = tpu.concatenate %236, %255, %274, %293 in 1 : vector<11x8xf32>, vector<11x8xf32>, vector<11x8xf32>, vector<11x8xf32> -> vector<11x32xf32>
    %c1_119 = arith.constant 1 : index
    %c0_120 = arith.constant 0 : index
    %c0_121 = arith.constant 0 : index
    %295 = vector.load %arg9[%c1_119, %c0_120, %c0_121] : memref<2x32x32xbf16, #tpu.memory_space<vmem>>, vector<1x32x32xbf16>
    %296 = vector.shape_cast %295 : vector<1x32x32xbf16> to vector<32x32xbf16>
    %c1_122 = arith.constant 1 : index
    %c0_123 = arith.constant 0 : index
    %c0_124 = arith.constant 0 : index
    %297 = vector.load %arg10[%c1_122, %c0_123, %c0_124] : memref<2x1x32xf32, #tpu.memory_space<vmem>>, vector<1x1x32xf32>
    %298 = vector.shape_cast %297 : vector<1x1x32xf32> to vector<1x32xf32>
    %299 = arith.truncf %294 : vector<11x32xf32> to vector<11x32xbf16>
    %cst_125 = arith.constant dense<0.000000e+00> : vector<11x32xf32>
    %300 = tpu.matmul %299, %296, %cst_125 {dimension_numbers = #tpu.dot_dimension_numbers<[1], [0], [0], [1], [0, 0, 1, 1], [], []>} : vector<11x32xbf16>, vector<32x32xbf16>, vector<11x32xf32> -> vector<11x32xf32>
    %301 = vector.broadcast %298 : vector<1x32xf32> to vector<11x32xf32>
    %302 = arith.addf %300, %301 : vector<11x32xf32>
    %303 = arith.addf %302, %206 : vector<11x32xf32>
    %c1_126 = arith.constant 1 : index
    %c0_127 = arith.constant 0 : index
    %c0_128 = arith.constant 0 : index
    %304 = vector.load %arg11[%c1_126, %c0_127, %c0_128] : memref<2x1x32xf32, #tpu.memory_space<vmem>>, vector<1x1x32xf32>
    %305 = vector.shape_cast %304 : vector<1x1x32xf32> to vector<1x32xf32>
    %c1_129 = arith.constant 1 : index
    %c0_130 = arith.constant 0 : index
    %c0_131 = arith.constant 0 : index
    %306 = vector.load %arg12[%c1_129, %c0_130, %c0_131] : memref<2x1x32xf32, #tpu.memory_space<vmem>>, vector<1x1x32xf32>
    %307 = vector.shape_cast %306 : vector<1x1x32xf32> to vector<1x32xf32>
    %cst_132 = arith.constant dense<0.000000e+00> : vector<11xf32>
    %308 = vector.multi_reduction <add>, %303, %cst_132 [1] : vector<11x32xf32> to vector<11xf32>
    %309 = vector.shape_cast %308 : vector<11xf32> to vector<11x1xf32>
    %cst_133 = arith.constant 3.200000e+01 : f32
    %310 = vector.broadcast %cst_133 : f32 to vector<11x1xf32>
    %311 = arith.divf %309, %310 : vector<11x1xf32>
    %312 = vector.broadcast %311 : vector<11x1xf32> to vector<11x32xf32>
    %313 = arith.subf %303, %312 : vector<11x32xf32>
    %314 = arith.mulf %313, %313 : vector<11x32xf32>
    %cst_134 = arith.constant dense<0.000000e+00> : vector<11xf32>
    %315 = vector.multi_reduction <add>, %314, %cst_134 [1] : vector<11x32xf32> to vector<11xf32>
    %316 = vector.shape_cast %315 : vector<11xf32> to vector<11x1xf32>
    %cst_135 = arith.constant 3.200000e+01 : f32
    %317 = vector.broadcast %cst_135 : f32 to vector<11x1xf32>
    %318 = arith.divf %316, %317 : vector<11x1xf32>
    %cst_136 = arith.constant 9.99999996E-13 : f32
    %319 = vector.broadcast %cst_136 : f32 to vector<11x1xf32>
    %320 = arith.addf %318, %319 : vector<11x1xf32>
    %321 = math.rsqrt %320 : vector<11x1xf32>
    %322 = vector.broadcast %321 : vector<11x1xf32> to vector<11x32xf32>
    %323 = arith.mulf %313, %322 : vector<11x32xf32>
    %324 = vector.broadcast %305 : vector<1x32xf32> to vector<11x32xf32>
    %325 = arith.mulf %323, %324 : vector<11x32xf32>
    %326 = vector.broadcast %307 : vector<1x32xf32> to vector<11x32xf32>
    %327 = arith.addf %325, %326 : vector<11x32xf32>
    %c1_137 = arith.constant 1 : index
    %c0_138 = arith.constant 0 : index
    %c0_139 = arith.constant 0 : index
    %328 = vector.load %arg13[%c1_137, %c0_138, %c0_139] : memref<2x32x64xbf16, #tpu.memory_space<vmem>>, vector<1x32x64xbf16>
    %329 = vector.shape_cast %328 : vector<1x32x64xbf16> to vector<32x64xbf16>
    %c1_140 = arith.constant 1 : index
    %c0_141 = arith.constant 0 : index
    %c0_142 = arith.constant 0 : index
    %330 = vector.load %arg14[%c1_140, %c0_141, %c0_142] : memref<2x1x64xf32, #tpu.memory_space<vmem>>, vector<1x1x64xf32>
    %331 = vector.shape_cast %330 : vector<1x1x64xf32> to vector<1x64xf32>
    %332 = arith.truncf %327 : vector<11x32xf32> to vector<11x32xbf16>
    %cst_143 = arith.constant dense<0.000000e+00> : vector<11x64xf32>
    %333 = tpu.matmul %332, %329, %cst_143 {dimension_numbers = #tpu.dot_dimension_numbers<[1], [0], [0], [1], [0, 0, 1, 1], [], []>} : vector<11x32xbf16>, vector<32x64xbf16>, vector<11x64xf32> -> vector<11x64xf32>
    %334 = vector.broadcast %331 : vector<1x64xf32> to vector<11x64xf32>
    %335 = arith.addf %333, %334 : vector<11x64xf32>
    %cst_144 = arith.constant 5.000000e-01 : f32
    %336 = vector.broadcast %cst_144 : f32 to vector<11x64xf32>
    %337 = arith.mulf %336, %335 : vector<11x64xf32>
    %cst_145 = arith.constant 4.471500e-02 : f32
    %338 = vector.broadcast %cst_145 : f32 to vector<11x64xf32>
    %339 = arith.mulf %338, %335 : vector<11x64xf32>
    %340 = arith.mulf %339, %335 : vector<11x64xf32>
    %341 = arith.mulf %340, %335 : vector<11x64xf32>
    %342 = arith.addf %335, %341 : vector<11x64xf32>
    %cst_146 = arith.constant 0.797884583 : f32
    %343 = vector.broadcast %cst_146 : f32 to vector<11x64xf32>
    %344 = arith.mulf %343, %342 : vector<11x64xf32>
    %345 = math.tanh %344 : vector<11x64xf32>
    %cst_147 = arith.constant 1.000000e+00 : f32
    %346 = vector.broadcast %cst_147 : f32 to vector<11x64xf32>
    %347 = arith.addf %346, %345 : vector<11x64xf32>
    %348 = arith.mulf %337, %347 : vector<11x64xf32>
    %c1_148 = arith.constant 1 : index
    %c0_149 = arith.constant 0 : index
    %c0_150 = arith.constant 0 : index
    %349 = vector.load %arg15[%c1_148, %c0_149, %c0_150] : memref<2x64x32xbf16, #tpu.memory_space<vmem>>, vector<1x64x32xbf16>
    %350 = vector.shape_cast %349 : vector<1x64x32xbf16> to vector<64x32xbf16>
    %c1_151 = arith.constant 1 : index
    %c0_152 = arith.constant 0 : index
    %c0_153 = arith.constant 0 : index
    %351 = vector.load %arg16[%c1_151, %c0_152, %c0_153] : memref<2x1x32xf32, #tpu.memory_space<vmem>>, vector<1x1x32xf32>
    %352 = vector.shape_cast %351 : vector<1x1x32xf32> to vector<1x32xf32>
    %353 = arith.truncf %348 : vector<11x64xf32> to vector<11x64xbf16>
    %cst_154 = arith.constant dense<0.000000e+00> : vector<11x32xf32>
    %354 = tpu.matmul %353, %350, %cst_154 {dimension_numbers = #tpu.dot_dimension_numbers<[1], [0], [0], [1], [0, 0, 1, 1], [], []>} : vector<11x64xbf16>, vector<64x32xbf16>, vector<11x32xf32> -> vector<11x32xf32>
    %355 = vector.broadcast %352 : vector<1x32xf32> to vector<11x32xf32>
    %356 = arith.addf %354, %355 : vector<11x32xf32>
    %357 = arith.addf %356, %327 : vector<11x32xf32>
    %c1_155 = arith.constant 1 : index
    %c0_156 = arith.constant 0 : index
    %c0_157 = arith.constant 0 : index
    %358 = vector.load %arg17[%c1_155, %c0_156, %c0_157] : memref<2x1x32xf32, #tpu.memory_space<vmem>>, vector<1x1x32xf32>
    %359 = vector.shape_cast %358 : vector<1x1x32xf32> to vector<1x32xf32>
    %c1_158 = arith.constant 1 : index
    %c0_159 = arith.constant 0 : index
    %c0_160 = arith.constant 0 : index
    %360 = vector.load %arg18[%c1_158, %c0_159, %c0_160] : memref<2x1x32xf32, #tpu.memory_space<vmem>>, vector<1x1x32xf32>
    %361 = vector.shape_cast %360 : vector<1x1x32xf32> to vector<1x32xf32>
    %cst_161 = arith.constant dense<0.000000e+00> : vector<11xf32>
    %362 = vector.multi_reduction <add>, %357, %cst_161 [1] : vector<11x32xf32> to vector<11xf32>
    %363 = vector.shape_cast %362 : vector<11xf32> to vector<11x1xf32>
    %cst_162 = arith.constant 3.200000e+01 : f32
    %364 = vector.broadcast %cst_162 : f32 to vector<11x1xf32>
    %365 = arith.divf %363, %364 : vector<11x1xf32>
    %366 = vector.broadcast %365 : vector<11x1xf32> to vector<11x32xf32>
    %367 = arith.subf %357, %366 : vector<11x32xf32>
    %368 = arith.mulf %367, %367 : vector<11x32xf32>
    %cst_163 = arith.constant dense<0.000000e+00> : vector<11xf32>
    %369 = vector.multi_reduction <add>, %368, %cst_163 [1] : vector<11x32xf32> to vector<11xf32>
    %370 = vector.shape_cast %369 : vector<11xf32> to vector<11x1xf32>
    %cst_164 = arith.constant 3.200000e+01 : f32
    %371 = vector.broadcast %cst_164 : f32 to vector<11x1xf32>
    %372 = arith.divf %370, %371 : vector<11x1xf32>
    %cst_165 = arith.constant 9.99999996E-13 : f32
    %373 = vector.broadcast %cst_165 : f32 to vector<11x1xf32>
    %374 = arith.addf %372, %373 : vector<11x1xf32>
    %375 = math.rsqrt %374 : vector<11x1xf32>
    %376 = vector.broadcast %375 : vector<11x1xf32> to vector<11x32xf32>
    %377 = arith.mulf %367, %376 : vector<11x32xf32>
    %378 = vector.broadcast %359 : vector<1x32xf32> to vector<11x32xf32>
    %379 = arith.mulf %377, %378 : vector<11x32xf32>
    %380 = vector.broadcast %361 : vector<1x32xf32> to vector<11x32xf32>
    %381 = arith.addf %379, %380 : vector<11x32xf32>
    %382 = vector.extract_strided_slice %381 {offsets = [0, 0], sizes = [1, 32], strides = [1, 1]} : vector<11x32xf32> to vector<1x32xf32>
    %383 = arith.truncf %382 : vector<1x32xf32> to vector<1x32xbf16>
    %c0_166 = arith.constant 0 : index
    %c0_167 = arith.constant 0 : index
    %384 = vector.load %arg19[%c0_166, %c0_167] : memref<32x32xbf16, #tpu.memory_space<vmem>>, vector<32x32xbf16>
    %cst_168 = arith.constant dense<0.000000e+00> : vector<1x32xf32>
    %385 = tpu.matmul %383, %384, %cst_168 {dimension_numbers = #tpu.dot_dimension_numbers<[1], [0], [0], [1], [0, 0, 1, 1], [], []>} : vector<1x32xbf16>, vector<32x32xbf16>, vector<1x32xf32> -> vector<1x32xf32>
    %c0_169 = arith.constant 0 : index
    %c0_170 = arith.constant 0 : index
    %386 = vector.load %arg20[%c0_169, %c0_170] : memref<1x32xf32, #tpu.memory_space<vmem>>, vector<1x32xf32>
    %387 = arith.addf %385, %386 : vector<1x32xf32>
    %388 = math.tanh %387 : vector<1x32xf32>
    %c0_171 = arith.constant 0 : index
    %c0_172 = arith.constant 0 : index
    %c0_173 = arith.constant 0 : index
    %389 = vector.load %arg21[%c0_171, %c0_172, %c0_173] : memref<1x1x32xf32, #tpu.memory_space<vmem>>, vector<1x1x32xf32>
    %390 = vector.shape_cast %389 : vector<1x1x32xf32> to vector<1x32xf32>
    %391 = vector.shape_cast %388 : vector<1x32xf32> to vector<1x1x32xf32>
    tpu.vector_store %arg21[%c0_171, %c0_172, %c0_173], %391 {strides = array<i32>} : memref<1x1x32xf32, #tpu.memory_space<vmem>>, vector<1x1x32xf32>,
    return
  }
  func.func @transform_0(%arg0: i32) -> (i32, i32, i32) {
    %c0_i32 = arith.constant 0 : i32
    %c0_i32_0 = arith.constant 0 : i32
    %c0_i32_1 = arith.constant 0 : i32
    return %arg0, %c0_i32, %c0_i32_0 : i32, i32, i32
  }
  func.func @transform_1(%arg0: i32) -> (i32, i32, i32) {
    %c0_i32 = arith.constant 0 : i32
    %c0_i32_0 = arith.constant 0 : i32
    %c0_i32_1 = arith.constant 0 : i32
    return %arg0, %c0_i32, %c0_i32_0 : i32, i32, i32
  }
  func.func @transform_2(%arg0: i32) -> (i32, i32, i32) {
    %c0_i32 = arith.constant 0 : i32
    %c0_i32_0 = arith.constant 0 : i32
    %c0_i32_1 = arith.constant 0 : i32
    return %arg0, %c0_i32, %c0_i32_0 : i32, i32, i32
  }
  func.func @transform_3(%arg0: i32) -> (i32, i32) {
    %c0_i32 = arith.constant 0 : i32
    %c0_i32_0 = arith.constant 0 : i32
    %c0_i32_1 = arith.constant 0 : i32
    return %c0_i32, %c0_i32_0 : i32, i32
  }
  func.func @transform_4(%arg0: i32) -> (i32, i32) {
    %c0_i32 = arith.constant 0 : i32
    %c0_i32_0 = arith.constant 0 : i32
    %c0_i32_1 = arith.constant 0 : i32
    return %c0_i32, %c0_i32_0 : i32, i32
  }
  func.func @transform_5(%arg0: i32) -> (i32, i32) {
    %c0_i32 = arith.constant 0 : i32
    %c0_i32_0 = arith.constant 0 : i32
    %c0_i32_1 = arith.constant 0 : i32
    return %c0_i32, %c0_i32_0 : i32, i32
  }
  func.func @transform_6(%arg0: i32) -> (i32, i32, i32) {
    %c0_i32 = arith.constant 0 : i32
    %c0_i32_0 = arith.constant 0 : i32
    %c0_i32_1 = arith.constant 0 : i32
    %c0_i32_2 = arith.constant 0 : i32
    return %c0_i32, %c0_i32_0, %c0_i32_1 : i32, i32, i32
  }
  func.func @transform_7(%arg0: i32) -> (i32, i32, i32) {
    %c0_i32 = arith.constant 0 : i32
    %c0_i32_0 = arith.constant 0 : i32
    %c0_i32_1 = arith.constant 0 : i32
    %c0_i32_2 = arith.constant 0 : i32
    return %c0_i32, %c0_i32_0, %c0_i32_1 : i32, i32, i32
  }
  func.func @transform_8(%arg0: i32) -> (i32, i32, i32) {
    %c0_i32 = arith.constant 0 : i32
    %c0_i32_0 = arith.constant 0 : i32
    %c0_i32_1 = arith.constant 0 : i32
    %c0_i32_2 = arith.constant 0 : i32
    return %c0_i32, %c0_i32_0, %c0_i32_1 : i32, i32, i32
  }
  func.func @transform_9(%arg0: i32) -> (i32, i32, i32) {
    %c0_i32 = arith.constant 0 : i32
    %c0_i32_0 = arith.constant 0 : i32
    %c0_i32_1 = arith.constant 0 : i32
    %c0_i32_2 = arith.constant 0 : i32
    return %c0_i32, %c0_i32_0, %c0_i32_1 : i32, i32, i32
  }
  func.func @transform_10(%arg0: i32) -> (i32, i32, i32) {
    %c0_i32 = arith.constant 0 : i32
    %c0_i32_0 = arith.constant 0 : i32
    %c0_i32_1 = arith.constant 0 : i32
    %c0_i32_2 = arith.constant 0 : i32
    return %c0_i32, %c0_i32_0, %c0_i32_1 : i32, i32, i32
  }
  func.func @transform_11(%arg0: i32) -> (i32, i32, i32) {
    %c0_i32 = arith.constant 0 : i32
    %c0_i32_0 = arith.constant 0 : i32
    %c0_i32_1 = arith.constant 0 : i32
    %c0_i32_2 = arith.constant 0 : i32
    return %c0_i32, %c0_i32_0, %c0_i32_1 : i32, i32, i32
  }
  func.func @transform_12(%arg0: i32) -> (i32, i32, i32) {
    %c0_i32 = arith.constant 0 : i32
    %c0_i32_0 = arith.constant 0 : i32
    %c0_i32_1 = arith.constant 0 : i32
    %c0_i32_2 = arith.constant 0 : i32
    return %c0_i32, %c0_i32_0, %c0_i32_1 : i32, i32, i32
  }
  func.func @transform_13(%arg0: i32) -> (i32, i32, i32) {
    %c0_i32 = arith.constant 0 : i32
    %c0_i32_0 = arith.constant 0 : i32
    %c0_i32_1 = arith.constant 0 : i32
    %c0_i32_2 = arith.constant 0 : i32
    return %c0_i32, %c0_i32_0, %c0_i32_1 : i32, i32, i32
  }
  func.func @transform_14(%arg0: i32) -> (i32, i32, i32) {
    %c0_i32 = arith.constant 0 : i32
    %c0_i32_0 = arith.constant 0 : i32
    %c0_i32_1 = arith.constant 0 : i32
    %c0_i32_2 = arith.constant 0 : i32
    return %c0_i32, %c0_i32_0, %c0_i32_1 : i32, i32, i32
  }
  func.func @transform_15(%arg0: i32) -> (i32, i32, i32) {
    %c0_i32 = arith.constant 0 : i32
    %c0_i32_0 = arith.constant 0 : i32
    %c0_i32_1 = arith.constant 0 : i32
    %c0_i32_2 = arith.constant 0 : i32
    return %c0_i32, %c0_i32_0, %c0_i32_1 : i32, i32, i32
  }
  func.func @transform_16(%arg0: i32) -> (i32, i32, i32) {
    %c0_i32 = arith.constant 0 : i32
    %c0_i32_0 = arith.constant 0 : i32
    %c0_i32_1 = arith.constant 0 : i32
    %c0_i32_2 = arith.constant 0 : i32
    return %c0_i32, %c0_i32_0, %c0_i32_1 : i32, i32, i32
  }
  func.func @transform_17(%arg0: i32) -> (i32, i32, i32) {
    %c0_i32 = arith.constant 0 : i32
    %c0_i32_0 = arith.constant 0 : i32
    %c0_i32_1 = arith.constant 0 : i32
    %c0_i32_2 = arith.constant 0 : i32
    return %c0_i32, %c0_i32_0, %c0_i32_1 : i32, i32, i32
  }
  func.func @transform_18(%arg0: i32) -> (i32, i32) {
    %c0_i32 = arith.constant 0 : i32
    %c0_i32_0 = arith.constant 0 : i32
    %c0_i32_1 = arith.constant 0 : i32
    return %c0_i32, %c0_i32_0 : i32, i32
  }
  func.func @transform_19(%arg0: i32) -> (i32, i32) {
    %c0_i32 = arith.constant 0 : i32
    %c0_i32_0 = arith.constant 0 : i32
    %c0_i32_1 = arith.constant 0 : i32
    return %c0_i32, %c0_i32_0 : i32, i32
  }
  func.func @transform_20(%arg0: i32) -> (i32, i32, i32) {
    %c0_i32 = arith.constant 0 : i32
    %c0_i32_0 = arith.constant 0 : i32
    %c0_i32_1 = arith.constant 0 : i32
    return %arg0, %c0_i32, %c0_i32_0 : i32, i32, i32
  }
}

</mosaic_0001>

<bundles_post_ra>
// kernel: forward.1
= control target key start
LH: loop header
LB: loop body
LE: loop exit
PB: predicated region body
PF: predicated region fallthrough
CT: control target
= control target key end

     0   :  { %s3497_s0 = inlined_call_operand.vmem [shape: f32[2,11,32], index: 0, kind: input, shape index: {}]   ;;  %s3498_s1 = inlined_call_operand.vmem [shape: f32[2,11,16], index: 1, kind: input, shape index: {}]   ;;  %s3499_s2 = inlined_call_operand.vmem [shape: f32[2,1,11], index: 2, kind: input, shape index: {}]   ;;  %s3500_s3 = inlined_call_operand.vmem [shape: bf16[16,32], index: 3, kind: input, shape index: {}]   ;;  %s3501_s4 = inlined_call_operand.vmem [shape: f32[1,32], index: 4, kind: input, shape index: {}]   ;;  %s3502_s5 = inlined_call_operand.vmem [shape: f32[1,32], index: 5, kind: input, shape index: {}]   ;;  %s3503_s6 = inlined_call_operand.vmem [shape: bf16[2,32,96], index: 6, kind: input, shape index: {}]   ;;  %s3504_s7 = inlined_call_operand.vmem [shape: f32[2,1,96], index: 7, kind: input, shape index: {}]   ;;  %s3505_s8 = inlined_call_operand.vmem [shape: bf16[2,32,32], index: 8, kind: input, shape index: {}]   ;;  %s3506_s9 = inlined_call_operand.vmem [shape: f32[2,1,32], index: 9, kind: input, shape index: {}]   ;;  %s3507_s10 = inlined_call_operand.vmem [shape: f32[2,1,32], index: 10, kind: input, shape index: {}]   ;;  %s3508_s11 = inlined_call_operand.vmem [shape: f32[2,1,32], index: 11, kind: input, shape index: {}]   ;;  %s3509_s12 = inlined_call_operand.vmem [shape: bf16[2,32,64], index: 12, kind: input, shape index: {}]   ;;  %s3510_s13 = inlined_call_operand.vmem [shape: f32[2,1,64], index: 13, kind: input, shape index: {}]   ;;  %s3511_s14 = inlined_call_operand.vmem [shape: bf16[2,64,32], index: 14, kind: input, shape index: {}]   ;;  %s3512_s15 = inlined_call_operand.vmem [shape: f32[2,1,32], index: 15, kind: input, shape index: {}]   ;;  %s3513_s16 = inlined_call_operand.vmem [shape: f32[2,1,32], index: 16, kind: input, shape index: {}]   ;;  %s3514_s17 = inlined_call_operand.vmem [shape: f32[2,1,32], index: 17, kind: input, shape index: {}]   ;;  %s3515_s18 = inlined_call_operand.vmem [shape: bf16[32,32], index: 18, kind: input, shape index: {}]   ;;  %s3516_s19 = inlined_call_operand.vmem [shape: f32[1,32], index: 19, kind: input, shape index: {}]   ;;  %s3517_s20 = inlined_call_operand.hbm [shape: f32[2,1,32], index: 20, kind: output, shape index: {}]  }
   0x1   :  { %3546 = sst [smem:[#allocation12_spill]] %s3497_s0 }
   0x2   :  { %3547 = sst [smem:[#allocation13_spill]] %s3498_s1 }
   0x3   :  { %3548 = sst [smem:[#allocation14_spill]] %s3499_s2 }
   0x4   :  { %3549 = sst [smem:[#allocation15_spill]] %s3500_s3 }
   0x5   :  { %3550 = sst [smem:[#allocation16_spill]] %s3501_s4 }
   0x6   :  { %3551 = sst [smem:[#allocation17_spill]] %s3516_s19 }
   0x7   :  { %3552 = sst [smem:[#allocation18_spill]] %s3517_s20 }
   0x8   :  { %25 = vsyncpa [#allocation3], 0 }
   0x9   :  { %27 = vsyncpa [#allocation3 + $0x1], 0  ;;  %s2956_s1 = smov 0   ;;  %s2958_s22 = smov 0  }
   0xa   :  { %s2960_s23 = smov 0   ;;  %s2962_s24 = smov 0  }
   0xb LB: > { %3553 = sst [smem:[#allocation5_spill]] %s2822_s1  ;;  %s2977_s2 = sadd.s32 4294967295, %s2834_s24   ;;  %s2834_s24 = sphi %s2962_s24, %s3584_s24   ;;  %s2830_s23 = sphi %s2960_s23, %s3586_s23   ;;  %s2826_s22 = sphi %s2958_s22, %s3588_s22   ;;  %s2822_s1 = sphi %s2956_s1, %s3587_s1  }
   0xc   : > { %3554 = sst [smem:[#allocation6_spill]] %s2830_s23  ;;  %s2350_s25 = sadd.s32 4294967294, %s2834_s24  }
   0xd   : > { %3555 = sst [smem:[#allocation7_spill]] %s2834_s24  ;;  %s2981_s3 = sadd.s32 1, %s2834_s24  }
   0xe   : > { %3556 = sst [smem:[#allocation8_spill]] %s2981_s3  ;;  %s475_s26 = sadd.s32 1, %s2830_s23 }
   0xf   : > { %s472_s27 = ssub.s32 %s2834_s24, %s2981_s3  ;;  %p485_p0 = scmp.ne.s32.totalorder %s2830_s23, %s2826_s22 }
  0x10   : > { %p473_p1 = scmp.eq.s32.totalorder %s472_s27, 0  ;;  %p486_p2 = scmp.eq.s32.totalorder %s2977_s2, 1 }
  0x11   : > { %p491_p3 = scmp.ne.s32.totalorder %s2826_s22, %s2822_s1  ;;  %p492_p4 = scmp.eq.s32.totalorder %s2350_s25, 1 }
  0x12   : > { %s2992_s28 = scalar_select %p473_p1, %s2830_s23, %s475_s26  }
  0x13   : > { %p2994_p5 = por %p486_p2, %p485_p0  ;;  %p2998_p6 = por %p492_p4, %p491_p3 }
  0x14   : > { %3557 = sst [smem:[#allocation9_spill]] %s2992_s28  ;;  %p2353_p7 = scmp.ge.s32.totalorder %s2834_s24, 1 }
  0x15   : > { %s3558_s4 = scalar_select %p2994_p5, 1, 0 }
  0x16   : > { %s3560_s29 = scalar_select %p2998_p6, 1, 0 }
  0x17   : > { %3559 = sst [smem:[#allocation10_spill]] %s3558_s4  ;;  %p583_p8 = scmp.lt.s32.totalorder %s2834_s24, 3 }
  0x18   : > { %3561 = sst [smem:[#allocation11_spill]] %s3560_s29 }
  0x19   : > { %p584_p9 = pnand %p2353_p7, %p583_p8 }
  0x1a   : > { %s3562_s21 = sld [smem:[#allocation15_spill]] (!%p584_p9)  ;;  %p648_p10 = scmp.lt.s32.totalorder (!%p584_p9), %s2977_s2, 1 }
  0x1b   : > { %587 = sbr.rel (%p584_p9) target bundleno = 4513 (0x11a1), region = 100  ;;  %s3563_s23 = sld [smem:[#allocation14_spill]] (!%p584_p9) }
  0x1c   : > { %s3565_s4 = sld [smem:[#allocation13_spill]] (!%p584_p9)  ;;  %s3539_s1 = smov (!%p584_p9), 112  }
  0x1d   : > { %s3541_s24 = smov (!%p584_p9), 104   ;;  %s2843_s28 = smov (!%p584_p9), 80  }
  0x1e   : > { %s3528_s27 = smov (!%p584_p9), 40   ;;  %s3530_s30 = smov (!%p584_p9), 48  }
  0x1f   : > { %s3534_s0 = smov (!%p584_p9), 8  }
  0x20   : > { %v2548_v0 = vld [vmem:[%s3562_s21] sm:$0xff]  ;;  %s3009_s25 = scalar_select %p648_p10, %s2977_s2, 1  ;;  %vm675_vm0 = vcmask 130048   ;;  %vm697_vm1 = vcmask 261120   ;;  %vm701_vm2 = vcmask 256000   ;;  %v2836_v12 = vmov 32.0  }
  0x21   : > { %686 = vmatpush.bf16.msra.mxu0 %v2548_v0  ;;  %s3566_s21 = sld [smem:[#allocation12_spill]]  ;;  %2678 = vrcp.f32 %v2836_v12  ;;  %v2550_v29 = vld [vmem:[%s3503_s6 + $0x8] sm:$0xff]  ;;  %v2549_v31 = vld [vmem:[%s3503_s6] sm:$0xff]  ;;  %vm805_vm10 = vcmask 64512   ;;  %vm844_vm11 = vcmask 89088   ;;  %vm848_vm12 = vcmask 83968  }
  0x22   : > { %s2546_s26 = sshll.u32 %s3009_s25, 4  ;;  %s660_s29 = scalar_lea.vmem %s3563_s23, %s3009_s25  ;;  %791 = vmatpush.bf16.msra.mxu1 %v2550_v29  ;;  %v2661_v55 = vld [vmem:[%s3502_s5] ss:$0 sm:$0xff]  ;;  %vm879_vm13 = vcmask 1042432   ;;  %vm1236_vm14 = vcmask 195584  }
  0x23   : > { %s657_s20 = scalar_lea.vmem %s3565_s4, %s2546_s26  ;;  %s3567_s4 = sld [smem:[#allocation16_spill]]  ;;  %v2662_v60 = vld [vmem:[%s3504_s7] ss:$0 sm:$0xff] }
  0x24   : > { %v664_v1 = vld [vmem:[%s657_s20] sm:$0xff]  ;;  %v665_v2 = vld [vmem:[%s657_s20 + $0x8] sm:$0x7]  ;;  %s3543_s20 = smov 72   ;;  %s2841_s23 = smov 120  }
  0x25   : > { %v666_v3 = vpack.c.bf16 %v665_v2, %v664_v1  ;;  %s3537_s25 = smov 56  }
  0x26   : > { %792 = vmatpush.bf16.msra.mxu1 %v2549_v31 }
  0x27   : > { %2362 = vmatmul.msk.bf16.vlgmr.msra.gmra.mxu0 %vm675_vm0, %v666_v3  ;;  %s652_s19 = scalar_lea.vmem %s3566_s21, %s2546_s26  ;;  %v2679_v13 = vpop.eup %2678  ;;  %s2837_s21 = smov 88  }
  0x28   : > { %v662_v4 = vld [vmem:[%s652_s19] sm:$0xff]  ;;  %v663_v8 = vld [vmem:[%s652_s19 + $0x8] sm:$0x7]  ;;  %v706_v14 = vmul.f32 32.0, %v2679_v13  ;;  %vm710_vm3 = vweird.f32 %v2679_v13  ;;  %s2838_s19 = smov 96   ;;  %s3535_s26 = smov 24  }
  0x29   : > { %v2660_v50 = vld [vmem:[%s3567_s4] ss:$0 sm:$0xff]  ;;  %s3536_s4 = smov 16  }
  0x2a   : > { %v707_v15 = vsub.f32 1.0, %v706_v14 }
  0x2c   : > { %v708_v16 = vmul.f32 %v2679_v13, %v707_v15  ;;  %v3112_v15 = vld [vmem:[%s660_s29] ss:$0 sm:$0xff]  ;;  %s3532_s29 = smov 64  }
  0x2e   : > { %v709_v17 = vadd.f32 %v2679_v13, %v708_v16 }
  0x30   : > { %v3025_v18 = vsel %vm710_vm3, %v2679_v13, %v709_v17 }
  0xa4   : > { %v688_v5 = vpop.f32.mrf.mxu0 }
  0xa5   : > { %v693_v6 = vadd.f32 %v688_v5, %v662_v4 }
  0xa7   : > { %v698_v7 = vsel %vm697_vm1, %v693_v6, 0.0 }
  0xa8   : > { %699 = vadd.xlane.f32.xlu0 %v698_v7 }
  0xac   : > { %v690_v9 = vpop.f32.mrf.mxu0 }
  0xad   : > { %v694_v10 = vadd.f32 %v690_v9, %v663_v8 }
  0xaf   : > { %v702_v11 = vsel %vm701_vm2, %v694_v10, 0.0 }
  0xb0   : > { %703 = vadd.xlane.f32.xlu0 %v702_v11 }
 0x11b   : > { %v700_v19 = vpop.xlane.xlu0 %699 }
 0x11c   : > { %v712_v20 = vmul.f32 %v3025_v18, %v700_v19 }
 0x11e   : > { %v714_v21 = vsub.f32 %v693_v6, %v712_v20 }
 0x120   : > { %v716_v22 = vmul.f32 %v714_v21, %v714_v21 }
 0x122   : > { %v718_v23 = vsel %vm697_vm1, %v716_v22, 0.0 }
 0x123   : > { %719 = vadd.xlane.f32.xlu1 %v718_v23  ;;  %v704_v24 = vpop.xlane.xlu0 %703 }
 0x124   : > { %v713_v25 = vmul.f32 %v3025_v18, %v704_v24 }
 0x126   : > { %v715_v26 = vsub.f32 %v694_v10, %v713_v25 }
 0x128   : > { %v717_v27 = vmul.f32 %v715_v26, %v715_v26 }
 0x12a   : > { %v721_v28 = vsel %vm701_vm2, %v717_v27, 0.0 }
 0x12b   : > { %722 = vadd.xlane.f32.xlu1 %v721_v28 }
 0x196   : > { %v720_v30 = vpop.xlane.xlu1 %719 }
 0x197   : > { %v724_v32 = vmul.f32 %v720_v30, %v3025_v18 }
 0x199   : > { %v726_v33 = vadd.f32 1e-12, %v724_v32 }
 0x19b   : > { %2680 = vrsqrt.f32 %v726_v33  ;;  %vm734_vm5 = vweird.f32 %v726_v33 }
 0x19e   : > { %v723_v34 = vpop.xlane.xlu1 %722 }
 0x19f   : > { %v725_v35 = vmul.f32 %v723_v34, %v3025_v18 }
 0x1a1   : > { %v2681_v36 = vpop.eup %2680  ;;  %v727_v37 = vadd.f32 1e-12, %v725_v35 }
 0x1a2   : > { %v729_v38 = vmul.f32 %v2681_v36, %v726_v33  ;;  %vm735_vm4 = vweird.f32 %v2681_v36 }
 0x1a3   : > { %2682 = vrsqrt.f32 %v727_v37  ;;  %vm736_vm6 = vmor %vm734_vm5, %vm735_vm4  ;;  %vm744_vm8 = vweird.f32 %v727_v37 }
 0x1a4   : > { %v730_v39 = vmul.f32 %v2681_v36, %v729_v38 }
 0x1a6   : > { %v731_v40 = vmul.f32 0.5, %v730_v39 }
 0x1a8   : > { %v732_v41 = vsub.f32 1.5, %v731_v40 }
 0x1a9   : > { %v2683_v42 = vpop.eup %2682 }
 0x1aa   : > { %v733_v43 = vmul.f32 %v2681_v36, %v732_v41  ;;  %v739_v44 = vmul.f32 %v2683_v42, %v727_v37  ;;  %vm745_vm7 = vweird.f32 %v2683_v42 }
 0x1ab   : > { %vm746_vm9 = vmor %vm744_vm8, %vm745_vm7  ;;  %vm1428_vm8 = vcmask 523264  }
 0x1ac   : > { %v740_v45 = vmul.f32 %v2683_v42, %v739_v44  ;;  %v737_v46 = vsel %vm736_vm6, %v2681_v36, %v733_v43 }
 0x1ad   : > { %v748_v49 = vmul.f32 %v737_v46, %v714_v21 }
 0x1ae   : > { %v741_v47 = vmul.f32 0.5, %v740_v45 }
 0x1af   : > { %v753_v54 = vmul.f32 %v2660_v50, %v748_v49 }
 0x1b0   : > { %v742_v48 = vsub.f32 1.5, %v741_v47 }
 0x1b1   : > { %v3045_v57 = vadd.f32 %v2661_v55, %v753_v54 }
 0x1b2   : > { %v743_v51 = vmul.f32 %v2683_v42, %v742_v48 }
 0x1b4   : > { %v747_v52 = vsel %vm746_vm9, %v2683_v42, %v743_v51 }
 0x1b5   : > { %v749_v53 = vmul.f32 %v747_v52, %v715_v26 }
 0x1b7   : > { %v754_v56 = vmul.f32 %v2660_v50, %v749_v53 }
 0x1b9   : > { %v3047_v58 = vadd.f32 %v2661_v55, %v754_v56 }
 0x1bb   : > { %v766_v59 = vpack.c.bf16 %v3047_v58, %v3045_v57 }
 0x1bd   : > { %2371 = vmatmul.msk.bf16.vlgmr.msra.gmra.mxu1 %vm697_vm1, %v766_v59 }
 0x23a   : > { %v794_v61 = vpop.f32.mrf.mxu1 }
 0x23b   : > { %v3055_v62 = vadd.f32 %v2662_v60, %v794_v61 }
 0x23d   : > { %909 = vrot.lane.b32.xlu1 %v3055_v62, %s2837_s21 }
 0x242   : > { %v796_v63 = vpop.f32.mrf.mxu1 }
 0x243   : > { %v3059_v0 = vadd.f32 %v2662_v60, %v796_v63 }
 0x245   : > { %911 = vrot.lane.b32.xlu0 %v3059_v0, %s2837_s21  ;;  %803 = vrot.lane.b32.xlu2 %v3059_v0, %s2838_s19 }
 0x246   : > { %1111 = vrot.lane.b32.xlu1 %v3055_v62, %s3543_s20 }
 0x24d   : > { %1113 = vrot.lane.b32.xlu0 %v3059_v0, %s3543_s20  ;;  %801 = vrot.lane.b32.xlu2 %v3055_v62, %s2838_s19 }
 0x24e   : > { %1008 = vrot.lane.b32.xlu1 %v3059_v0, %s3539_s1 }
 0x255   : > { %1006 = vrot.lane.b32.xlu0 %v3055_v62, %s3539_s1  ;;  %905 = vrot.lane.b32.xlu2 %v3055_v62, %s2841_s23 }
 0x25d   : > { %1109 = vrot.lane.b32.xlu0 %v3059_v0, %s3541_s24  ;;  %1010 = vrot.lane.b32.xlu2 %v3055_v62, %s2843_s28 }
 0x265   : > { %907 = vrot.lane.b32.xlu2 %v3059_v0, %s2841_s23 }
 0x26d   : > { %1012 = vrot.lane.b32.xlu2 %v3059_v0, %s2843_s28 }
 0x275   : > { %1107 = vrot.lane.b32.xlu2 %v3055_v62, %s3541_s24  ;;  %s3568_s24 = smov 72  }
 0x29f   : > { %v804_v1 = vpop.permute.xlu2 %803 }
 0x2a0   : > { %2372 = vmatpush.xpose.msk.msra.mxu2 %vm805_vm10, %v804_v1 }
 0x2a7   : > { %v802_v2 = vpop.permute.xlu2 %801 }
 0x2a8   : > { %2373 = vmatpush.xpose.msk.msra.mxu2 %vm805_vm10, %v802_v2 }
 0x2ab   : > { %2374 = vmatmul.msk.f32.vlgmr.msra.gmra.mxu2 %vm805_vm10, %v3055_v62 }
 0x2af   : > { %v906_v3 = vpop.permute.xlu2 %905  ;;  %v910_v6 = vpop.permute.xlu1 %909 }
 0x2b3   : > { %2375 = vmatmul.msk.f32.gmra.mxu2 %vm805_vm10, %v3059_v0 }
 0x2b7   : > { %v912_v4 = vpop.permute.xlu0 %911  ;;  %v1011_v5 = vpop.permute.xlu2 %1010 }
 0x2b8   : > { %2379 = vmatpush.xpose.msk.msrb.mxu0 %vm805_vm10, %v912_v4  ;;  %2573 = vmatpush.xpose.msk.msrb.mxu1 %vm805_vm10, %v912_v4  ;;  %v1112_v9 = vpop.permute.xlu1 %1111 }
 0x2bc   : > { %2380 = vmatpush.xpose.msk.msrb.mxu0 %vm805_vm10, %v910_v6  ;;  %2574 = vmatpush.xpose.msk.msrb.mxu1 %vm805_vm10, %v910_v6 }
 0x2bf   : > { %v1114_v7 = vpop.permute.xlu0 %1113  ;;  %2381 = vmatmul.msk.f32.vlgmr.msrb.gmra.mxu0 %vm805_vm10, %v906_v3  ;;  %v908_v8 = vpop.permute.xlu2 %907 }
 0x2c0   : > { %2382 = vmatmul.msk.f32.vlgmr.msrb.gmra.mxu1 %vm805_vm10, %v908_v8  ;;  %2393 = vmatpush.xpose.msk.msra.mxu0 %vm805_vm10, %v1114_v7  ;;  %v1009_v13 = vpop.permute.xlu1 %1008 }
 0x2c4   : > { %2394 = vmatpush.xpose.msk.msra.mxu0 %vm805_vm10, %v1112_v9 }
 0x2c7   : > { %v1013_v10 = vpop.permute.xlu2 %1012  ;;  %v1007_v11 = vpop.permute.xlu0 %1006 }
 0x2c8   : > { %2386 = vmatpush.xpose.msk.msra.mxu1 %vm805_vm10, %v1013_v10 }
 0x2cc   : > { %2387 = vmatpush.xpose.msk.msra.mxu1 %vm805_vm10, %v1011_v5 }
 0x2cf   : > { %2388 = vmatmul.msk.f32.vlgmr.msra.gmra.mxu1 %vm805_vm10, %v1007_v11  ;;  %v1108_v12 = vpop.permute.xlu2 %1107  ;;  %v1110_v14 = vpop.permute.xlu0 %1109 }
 0x2d0   : > { %2395 = vmatmul.msk.f32.vlgmr.msra.gmra.mxu0 %vm805_vm10, %v1108_v12 }
 0x2d7   : > { %2389 = vmatmul.msk.f32.gmra.mxu1 %vm805_vm10, %v1009_v13 }
 0x2d8   : > { %2396 = vmatmul.msk.f32.gmra.mxu0 %vm805_vm10, %v1110_v14 }
 0x32e   : > { %v831_v16 = vpop.f32.mrf.mxu2 }
 0x32f   : > { %v837_v17 = vmul.f32 0.35355338, %v831_v16 }
 0x331   : > { %v842_v19 = vadd.f32 %v3112_v15, %v837_v17 }
 0x333   : > { %v845_v20 = vsel %vm844_vm11, %v842_v19, -inf }
 0x334   : > { %846 = vmax.xlane.f32.xlu0 %v845_v20 }
 0x336   : > { %v834_v25 = vpop.f32.mrf.mxu2 }
 0x337   : > { %v838_v29 = vmul.f32 0.35355338, %v834_v25 }
 0x339   : > { %v3121_v31 = vadd.f32 %v3112_v15, %v838_v29 }
 0x33b   : > { %v849_v32 = vsel %vm848_vm12, %v3121_v31, -inf }
 0x33c   : > { %v938_v21 = vpop.f32.mrf.mxu0 }
 0x33d   : > { %v944_v22 = vmul.f32 0.35355338, %v938_v21  ;;  %v941_v23 = vpop.f32.mrf.mxu1 }
 0x33e   : > { %v945_v24 = vmul.f32 0.35355338, %v941_v23 }
 0x33f   : > { %v946_v26 = vadd.f32 %v3112_v15, %v944_v22 }
 0x340   : > { %v947_v27 = vadd.f32 %v3112_v15, %v945_v24 }
 0x341   : > { %v948_v28 = vsel %vm844_vm11, %v946_v26, -inf }
 0x342   : > { %949 = vmax.xlane.f32.xlu1 %v948_v28  ;;  %v951_v30 = vsel %vm848_vm12, %v947_v27, -inf }
 0x343   : > { %952 = vmax.xlane.f32.xlu2 %v951_v30 }
 0x34b   : > { %850 = vmax.xlane.f32.xlu2 %v849_v32 }
 0x34c   : > { %v1039_v33 = vpop.f32.mrf.mxu1 }
 0x34d   : > { %v1045_v34 = vmul.f32 0.35355338, %v1039_v33  ;;  %v1140_v35 = vpop.f32.mrf.mxu0 }
 0x34e   : > { %v1146_v36 = vmul.f32 0.35355338, %v1140_v35 }
 0x34f   : > { %v1047_v37 = vadd.f32 %v3112_v15, %v1045_v34 }
 0x350   : > { %v1148_v38 = vadd.f32 %v3112_v15, %v1146_v36 }
 0x351   : > { %v1049_v39 = vsel %vm844_vm11, %v1047_v37, -inf }
 0x352   : > { %1050 = vmax.xlane.f32.xlu1 %v1049_v39  ;;  %v1150_v40 = vsel %vm844_vm11, %v1148_v38, -inf }
 0x353   : > { %1151 = vmax.xlane.f32.xlu0 %v1150_v40 }
 0x354   : > { %v1042_v41 = vpop.f32.mrf.mxu1 }
 0x355   : > { %v1046_v42 = vmul.f32 0.35355338, %v1042_v41  ;;  %v1143_v44 = vpop.f32.mrf.mxu0 }
 0x356   : > { %v1147_v46 = vmul.f32 0.35355338, %v1143_v44 }
 0x357   : > { %v3140_v43 = vadd.f32 %v3112_v15, %v1046_v42 }
 0x358   : > { %v3145_v47 = vadd.f32 %v3112_v15, %v1147_v46 }
 0x359   : > { %v1052_v45 = vsel %vm848_vm12, %v3140_v43, -inf }
 0x35a   : > { %v1153_v48 = vsel %vm848_vm12, %v3145_v47, -inf }
 0x363   : > { %870 = vrot.lane.b32.xlu2 %v3059_v0, %s3532_s29 }
 0x367   : > { %868 = vrot.lane.b32.xlu0 %v3055_v62, %s3532_s29 }
 0x36b   : > { %972 = vrot.lane.b32.xlu1 %v3059_v0, %s3537_s25 }
 0x36f   : > { %970 = vrot.lane.b32.xlu0 %v3055_v62, %s3537_s25  ;;  %s3569_s25 = smov 104  }
 0x377   : > { %1174 = vrot.lane.b32.xlu0 %v3059_v0, %s3528_s27 }
 0x38c   : > { %1053 = vmax.xlane.f32.xlu2 %v1052_v45 }
 0x395   : > { %1154 = vmax.xlane.f32.xlu1 %v1153_v48 }
 0x3a7   : > { %v847_v49 = vpop.xlane.xlu0 %846 }
 0x3a8   : > { %v852_v54 = vsub.f32 %v842_v19, %v847_v49 }
 0x3aa   : > { %v854_v59 = vmul.f32 1.442695, %v852_v54 }
 0x3b5   : > { %v950_v50 = vpop.xlane.xlu1 %949 }
 0x3b6   : > { %v954_v51 = vsub.f32 %v946_v26, %v950_v50  ;;  %v953_v52 = vpop.xlane.xlu2 %952 }
 0x3b7   : > { %v955_v53 = vsub.f32 %v947_v27, %v953_v52 }
 0x3b8   : > { %v956_v55 = vmul.f32 1.442695, %v954_v51 }
 0x3b9   : > { %v958_v56 = vmul.f32 1.442695, %v955_v53 }
 0x3ba   : > { %2684 = vpow2.f32 %v956_v55 }
 0x3bb   : > { %2686 = vpow2.f32 %v958_v56 }
 0x3bc   : > { %2688 = vpow2.f32 %v854_v59 }
 0x3be   : > { %v851_v60 = vpop.xlane.xlu2 %850 }
 0x3bf   : > { %v853_v9 = vsub.f32 %v3121_v31, %v851_v60 }
 0x3c0   : > { %v3149_v61 = vpop.eup %2684 }
 0x3c1   : > { %v3151_v63 = vpop.eup %2686  ;;  %v960_v1 = vsel %vm844_vm11, %v3149_v61, 0.0  ;;  %v856_v13 = vmul.f32 1.442695, %v853_v9 }
 0x3c2   : > { %961 = vadd.xlane.f32.xlu1 %v960_v1  ;;  %v963_v2 = vsel %vm848_vm12, %v3151_v63, 0.0  ;;  %v2689_v4 = vpop.eup %2688 }
 0x3c3   : > { %964 = vadd.xlane.f32.xlu2 %v963_v2  ;;  %v858_v12 = vsel %vm844_vm11, %v2689_v4, 0.0 }
 0x3c5   : > { %v1051_v3 = vpop.xlane.xlu1 %1050 }
 0x3c6   : > { %v1055_v5 = vsub.f32 %v1047_v37, %v1051_v3  ;;  %v1152_v6 = vpop.xlane.xlu0 %1151  ;;  %v871_v7 = vpop.permute.xlu2 %870 }
 0x3c7   : > { %v1156_v8 = vsub.f32 %v1148_v38, %v1152_v6  ;;  %2376 = vmatpush.msk.msrb.mxu2 %vm879_vm13, %v871_v7  ;;  %2571 = vmatpush.msk.msra.mxu3 %vm879_vm13, %v871_v7 }
 0x3c8   : > { %v1057_v10 = vmul.f32 1.442695, %v1055_v5 }
 0x3c9   : > { %v1158_v11 = vmul.f32 1.442695, %v1156_v8 }
 0x3ca   : > { %2690 = vpow2.f32 %v1057_v10  ;;  %859 = vadd.xlane.f32.xlu1 %v858_v12  ;;  %v2552_v12 = vld [vmem:[%s3505_s8 + $0x8] sm:$0xff] }
 0x3cb   : > { %2692 = vpow2.f32 %v1158_v11  ;;  %1269 = vmatpush.bf16.msrb.mxu1 %v2552_v12 }
 0x3cc   : > { %2694 = vpow2.f32 %v856_v13  ;;  %v2551_v13 = vld [vmem:[%s3505_s8] sm:$0xff] }
 0x3cf   : > { %1270 = vmatpush.bf16.msrb.mxu1 %v2551_v13 }
 0x3d0   : > { %v2691_v14 = vpop.eup %2690 }
 0x3d1   : > { %v3161_v16 = vpop.eup %2692  ;;  %v1061_v17 = vsel %vm844_vm11, %v2691_v14, 0.0 }
 0x3d2   : > { %1062 = vadd.xlane.f32.xlu0 %v1061_v17  ;;  %v1162_v19 = vsel %vm844_vm11, %v3161_v16, 0.0  ;;  %v2695_v20 = vpop.eup %2694 }
 0x3d3   : > { %1163 = vadd.xlane.f32.xlu1 %v1162_v19  ;;  %v861_v22 = vsel %vm848_vm12, %v2695_v20, 0.0 }
 0x3d9   : > { %v869_v21 = vpop.permute.xlu0 %868 }
 0x3da   : > { %862 = vadd.xlane.f32.xlu0 %v861_v22  ;;  %897 = vmatpush.msrb.mxu2 %v869_v21 }
 0x3db   : > { %2572 = vmatpush.msra.mxu3 %v869_v21  ;;  %1073 = vrot.lane.b32.xlu2 %v3059_v0, %s3530_s30 }
 0x3dd   : > { %v973_v23 = vpop.permute.xlu1 %972 }
 0x3de   : > { %2383 = vmatpush.msk.msrb.mxu3 %vm879_vm13, %v973_v23 }
 0x3e1   : > { %v971_v24 = vpop.permute.xlu0 %970 }
 0x3e2   : > { %998 = vmatpush.msrb.mxu3 %v971_v24 }
 0x3e9   : > { %v1175_v36 = vpop.permute.xlu0 %1174 }
 0x3ec   : > { %1071 = vrot.lane.b32.xlu1 %v3055_v62, %s3530_s30  ;;  %s3576_s30 = smov 16  }
 0x3ff   : > { %v1054_v25 = vpop.xlane.xlu2 %1053 }
 0x400   : > { %v1056_v26 = vsub.f32 %v3140_v43, %v1054_v25 }
 0x402   : > { %v1059_v27 = vmul.f32 1.442695, %v1056_v26 }
 0x404   : > { %2696 = vpow2.f32 %v1059_v27 }
 0x408   : > { %v1155_v28 = vpop.xlane.xlu1 %1154 }
 0x409   : > { %v1157_v29 = vsub.f32 %v3145_v47, %v1155_v28 }
 0x40a   : > { %v2697_v30 = vpop.eup %2696 }
 0x40b   : > { %v1160_v31 = vmul.f32 1.442695, %v1157_v29  ;;  %v1064_v0 = vsel %vm848_vm12, %v2697_v30, 0.0 }
 0x40c   : > { %1065 = vadd.xlane.f32.xlu0 %v1064_v0  ;;  %v2663_v0 = vld [vmem:[%s3506_s9] ss:$0 sm:$0xff] }
 0x40d   : > { %2698 = vpow2.f32 %v1160_v31 }
 0x413   : > { %v2699_v32 = vpop.eup %2698 }
 0x414   : > { %v1165_v33 = vsel %vm848_vm12, %v2699_v32, 0.0 }
 0x415   : > { %1166 = vadd.xlane.f32.xlu2 %v1165_v33 }
 0x420   : > { %1172 = vrot.lane.b32.xlu0 %v3055_v62, %s3528_s27 }
 0x435   : > { %v962_v34 = vpop.xlane.xlu1 %961 }
 0x436   : > { %v965_v35 = vpop.xlane.xlu2 %964 }
 0x43d   : > { %v860_v37 = vpop.xlane.xlu1 %859 }
 0x43e   : > { %2700 = vrcp.f32 %v860_v37  ;;  %v1074_v38 = vpop.permute.xlu2 %1073 }
 0x43f   : > { %2390 = vmatpush.msk.msra.mxu2 %vm879_vm13, %v1074_v38 }
 0x444   : > { %v2701_v39 = vpop.eup %2700 }
 0x445   : > { %v1063_v40 = vpop.xlane.xlu0 %1062  ;;  %v866_v41 = vmul.f32 %v2701_v39, %v2689_v4 }
 0x446   : > { %v1164_v62 = vpop.xlane.xlu1 %1163 }
 0x447   : > { %2377 = vmatmul.msk.f32.vlgmr.msrb.gmra.mxu2 %vm844_vm11, %v866_v41 }
 0x44d   : > { %v863_v42 = vpop.xlane.xlu0 %862 }
 0x44e   : > { %2702 = vrcp.f32 %v863_v42 }
 0x44f   : > { %2704 = vrcp.f32 %v962_v34 }
 0x450   : > { %2706 = vrcp.f32 %v1063_v40 }
 0x451   : > { %2708 = vrcp.f32 %v965_v35 }
 0x454   : > { %v2703_v43 = vpop.eup %2702 }
 0x455   : > { %v867_v44 = vmul.f32 %v2703_v43, %v2695_v20  ;;  %v2705_v45 = vpop.eup %2704 }
 0x456   : > { %v2707_v46 = vpop.eup %2706  ;;  %v968_v47 = vmul.f32 %v2705_v45, %v3149_v61 }
 0x457   : > { %2378 = vmatmul.msk.f32.vlgmr.msra.gmra.mxu3 %vm844_vm11, %v867_v44  ;;  %v1069_v48 = vmul.f32 %v2707_v46, %v2691_v14  ;;  %v2709_v50 = vpop.eup %2708 }
 0x458   : > { %2397 = vmatpush.msk.msra.mxu3 %vm879_vm13, %v1175_v36  ;;  %v969_v51 = vmul.f32 %v2709_v50, %v3151_v63 }
 0x45e   : > { %v1072_v49 = vpop.permute.xlu1 %1071 }
 0x45f   : > { %2384 = vmatmul.msk.f32.vlgmr.msrb.gmra.mxu3 %vm844_vm11, %v968_v47  ;;  %1099 = vmatpush.msra.mxu2 %v1072_v49 }
 0x460   : > { %2391 = vmatmul.msk.f32.vlgmr.msra.gmra.mxu2 %vm844_vm11, %v1069_v48 }
 0x467   : > { %2385 = vmatmul.msk.f32.gmra.mxu3 %vm844_vm11, %v969_v51  ;;  %v2553_v51 = vld [vmem:[%s3509_s12] sm:$0xff] }
 0x47f   : > { %v1066_v52 = vpop.xlane.xlu0 %1065 }
 0x480   : > { %2710 = vrcp.f32 %v1066_v52 }
 0x481   : > { %2712 = vrcp.f32 %v1164_v62 }
 0x486   : > { %v2711_v53 = vpop.eup %2710 }
 0x487   : > { %v1070_v54 = vmul.f32 %v2711_v53, %v2697_v30  ;;  %v2713_v56 = vpop.eup %2712 }
 0x488   : > { %v1167_v55 = vpop.xlane.xlu2 %1166  ;;  %v1170_v59 = vmul.f32 %v2713_v56, %v3161_v16 }
 0x489   : > { %2392 = vmatmul.msk.f32.gmra.mxu2 %vm844_vm11, %v1070_v54  ;;  %2714 = vrcp.f32 %v1167_v55 }
 0x48f   : > { %v2715_v61 = vpop.eup %2714 }
 0x490   : > { %v1171_v63 = vmul.f32 %v2715_v61, %v2699_v32 }
 0x492   : > { %v1173_v60 = vpop.permute.xlu0 %1172 }
 0x493   : > { %1200 = vmatpush.msra.mxu3 %v1173_v60 }
 0x494   : > { %2398 = vmatmul.msk.f32.vlgmr.msra.gmra.mxu3 %vm844_vm11, %v1170_v59 }
 0x49c   : > { %2399 = vmatmul.msk.f32.gmra.mxu3 %vm844_vm11, %v1171_v63 }
 0x4ca   : > { %v899_v5 = vpop.f32.mrf.mxu2 }
 0x4da   : > { %v902_v1 = vpop.f32.mrf.mxu3 }
 0x4e2   : > { %v1000_v2 = vpop.f32.mrf.mxu3 }
 0x4e3   : > { %v1101_v6 = vpop.f32.mrf.mxu2 }
 0x4ea   : > { %v1003_v3 = vpop.f32.mrf.mxu3 }
 0x4eb   : > { %v2634_v4 = vpack.i.bf16 %v1003_v3, %v1000_v2 }
 0x4ed   : > { %2635 = vrot.lane.b32.xlu1 %v2634_v4, %s3534_s0  ;;  %s3577_s0 = smov 24  }
 0x50c   : > { %v1104_v7 = vpop.f32.mrf.mxu2 }
 0x50d   : > { %v2629_v8 = vpack.i.bf16 %v1104_v7, %v1101_v6  ;;  %v2664_v7 = vld [vmem:[%s3507_s10] ss:$0 sm:$0xff] }
 0x50f   : > { %2630 = vrot.lane.b32.xlu0 %v2629_v8, %s3536_s4  ;;  %s3571_s4 = smov 56  }
 0x517   : > { %v1202_v9 = vpop.f32.mrf.mxu3 }
 0x51f   : > { %v1205_v10 = vpop.f32.mrf.mxu3 }
 0x520   : > { %v2639_v11 = vpack.i.bf16 %v1205_v10, %v1202_v9 }
 0x522   : > { %2640 = vrot.lane.b32.xlu1 %v2639_v11, %s3535_s26  ;;  %v2665_v11 = vld [vmem:[%s3508_s11] ss:$0 sm:$0xff]  ;;  %s3575_s26 = smov 8  }
 0x55f   : > { %v2636_v14 = vpop.permute.xlu1 %2635 }
 0x560   : > { %v2638_v17 = vunpack.i.h.bf16 %v2636_v14  ;;  %v2637_v19 = vunpack.i.l.bf16 %v2636_v14 }
 0x562   : > { %v1233_v23 = vsel %vm805_vm10, %v902_v1, %v2638_v17  ;;  %v1232_v24 = vsel %vm805_vm10, %v899_v5, %v2637_v19 }
 0x581   : > { %v2631_v16 = vpop.permute.xlu0 %2630 }
 0x582   : > { %v2633_v20 = vunpack.i.h.bf16 %v2631_v16  ;;  %v2632_v21 = vunpack.i.l.bf16 %v2631_v16 }
 0x584   : > { %v1235_v27 = vsel %vm675_vm0, %v1233_v23, %v2633_v20  ;;  %v1234_v28 = vsel %vm675_vm0, %v1232_v24, %v2632_v21  ;;  %v2558_v20 = vld [vmem:[%s3511_s14 + $0x18] sm:$0xff]  ;;  %v2557_v21 = vld [vmem:[%s3511_s14 + $0x10] sm:$0xff]  ;;  %v2555_v23 = vld [vmem:[%s3511_s14] sm:$0xff] }
 0x585   : > { %1436 = vmatpush.bf16.msrb.mxu0 %v2558_v20  ;;  %v2666_v24 = vld [vmem:[%s3510_s13] ss:$0 sm:$0xff] }
 0x589   : > { %1437 = vmatpush.bf16.msrb.mxu0 %v2557_v21 }
 0x594   : > { %v2641_v22 = vpop.permute.xlu1 %2640 }
 0x595   : > { %v2643_v25 = vunpack.i.h.bf16 %v2641_v22  ;;  %v2642_v26 = vunpack.i.l.bf16 %v2641_v22  ;;  %v2556_v22 = vld [vmem:[%s3511_s14 + $0x8] sm:$0xff] }
 0x596   : > { %1438 = vmatpush.bf16.msrb.mxu0 %v2556_v22 }
 0x597   : > { %v1238_v29 = vsel %vm1236_vm14, %v1235_v27, %v2643_v25  ;;  %v1237_v30 = vsel %vm1236_vm14, %v1234_v28, %v2642_v26 }
 0x598   : > { %v1244_v31 = vpack.c.bf16 %v1238_v29, %v1237_v30 }
 0x59a   : > { %2408 = vmatmul.msk.bf16.vlgmr.msrb.gmra.mxu1 %vm697_vm1, %v1244_v31  ;;  %1439 = vmatpush.bf16.msrb.mxu0 %v2555_v23 }
 0x617   : > { %v1272_v32 = vpop.f32.mrf.mxu1 }
 0x618   : > { %v1273_v33 = vadd.f32 %v2663_v0, %v1272_v32 }
 0x61a   : > { %v1277_v34 = vadd.f32 %v1273_v33, %v3045_v57 }
 0x61c   : > { %v1281_v35 = vsel %vm697_vm1, %v1277_v34, 0.0 }
 0x61d   : > { %1282 = vadd.xlane.f32.xlu0 %v1281_v35 }
 0x61f   : > { %v1274_v36 = vpop.f32.mrf.mxu1 }
 0x620   : > { %v1275_v37 = vadd.f32 %v2663_v0, %v1274_v36 }
 0x622   : > { %v1278_v38 = vadd.f32 %v1275_v37, %v3047_v58  ;;  %v2554_v58 = vld [vmem:[%s3509_s12 + $0x8] sm:$0xff] }
 0x623   : > { %1365 = vmatpush.bf16.msrb.mxu2 %v2554_v58 }
 0x624   : > { %v1284_v39 = vsel %vm701_vm2, %v1278_v38, 0.0 }
 0x625   : > { %1285 = vadd.xlane.f32.xlu1 %v1284_v39 }
 0x627   : > { %1366 = vmatpush.bf16.msrb.mxu2 %v2553_v51 }
 0x690   : > { %v1283_v40 = vpop.xlane.xlu0 %1282 }
 0x691   : > { %v1287_v41 = vmul.f32 %v1283_v40, %v3025_v18 }
 0x693   : > { %v1289_v42 = vsub.f32 %v1277_v34, %v1287_v41 }
 0x695   : > { %v1291_v43 = vmul.f32 %v1289_v42, %v1289_v42 }
 0x697   : > { %v1293_v44 = vsel %vm697_vm1, %v1291_v43, 0.0 }
 0x698   : > { %v1286_v62 = vpop.xlane.xlu1 %1285  ;;  %1294 = vadd.xlane.f32.xlu2 %v1293_v44 }
 0x699   : > { %v1288_v57 = vmul.f32 %v1286_v62, %v3025_v18 }
 0x69b   : > { %v1290_v45 = vsub.f32 %v1278_v38, %v1288_v57 }
 0x69d   : > { %v1292_v46 = vmul.f32 %v1290_v45, %v1290_v45 }
 0x69f   : > { %v1296_v47 = vsel %vm701_vm2, %v1292_v46, 0.0 }
 0x6a0   : > { %1297 = vadd.xlane.f32.xlu2 %v1296_v47 }
 0x70b   : > { %v1295_v48 = vpop.xlane.xlu2 %1294 }
 0x70c   : > { %v1299_v49 = vmul.f32 %v1295_v48, %v3025_v18 }
 0x70e   : > { %v1301_v50 = vadd.f32 1e-12, %v1299_v49 }
 0x710   : > { %2716 = vrsqrt.f32 %v1301_v50  ;;  %vm1309_vm3 = vweird.f32 %v1301_v50 }
 0x713   : > { %v1298_v52 = vpop.xlane.xlu2 %1297 }
 0x714   : > { %v1300_v53 = vmul.f32 %v1298_v52, %v3025_v18 }
 0x716   : > { %v2717_v54 = vpop.eup %2716  ;;  %v1302_v55 = vadd.f32 1e-12, %v1300_v53 }
 0x717   : > { %v1304_v56 = vmul.f32 %v2717_v54, %v1301_v50  ;;  %vm1310_vm15 = vweird.f32 %v2717_v54 }
 0x718   : > { %2718 = vrsqrt.f32 %v1302_v55  ;;  %vm1311_vm4 = vmor %vm1309_vm3, %vm1310_vm15  ;;  %vm1319_vm6 = vweird.f32 %v1302_v55 }
 0x719   : > { %v1305_v59 = vmul.f32 %v2717_v54, %v1304_v56 }
 0x71b   : > { %v1306_v60 = vmul.f32 0.5, %v1305_v59 }
 0x71d   : > { %v1307_v61 = vsub.f32 1.5, %v1306_v60 }
 0x71e   : > { %v2719_v63 = vpop.eup %2718 }
 0x71f   : > { %v1308_v1 = vmul.f32 %v2717_v54, %v1307_v61  ;;  %v1314_v2 = vmul.f32 %v2719_v63, %v1302_v55  ;;  %vm1320_vm5 = vweird.f32 %v2719_v63 }
 0x720   : > { %vm1321_vm7 = vmor %vm1319_vm6, %vm1320_vm5 }
 0x721   : > { %v1315_v3 = vmul.f32 %v2719_v63, %v1314_v2  ;;  %v1312_v4 = vsel %vm1311_vm4, %v2717_v54, %v1308_v1 }
 0x722   : > { %v1323_v8 = vmul.f32 %v1312_v4, %v1289_v42 }
 0x723   : > { %v1316_v5 = vmul.f32 0.5, %v1315_v3  ;;  %v2560_v3 = vld [vmem:[%s3503_s6 + $0x18] sm:$0xff] }
 0x724   : > { %v1328_v12 = vmul.f32 %v2664_v7, %v1323_v8  ;;  %1536 = vmatpush.bf16.msrb.mxu3 %v2560_v3 }
 0x725   : > { %v1317_v6 = vsub.f32 1.5, %v1316_v5 }
 0x726   : > { %v1333_v16 = vadd.f32 %v2665_v11, %v1328_v12 }
 0x727   : > { %v1318_v9 = vmul.f32 %v2719_v63, %v1317_v6 }
 0x729   : > { %v1322_v10 = vsel %vm1321_vm7, %v2719_v63, %v1318_v9 }
 0x72a   : > { %v1324_v13 = vmul.f32 %v1322_v10, %v1290_v45  ;;  %v2667_v45 = vld [vmem:[%s3512_s15] ss:$0 sm:$0xff] }
 0x72c   : > { %v1329_v14 = vmul.f32 %v2664_v7, %v1324_v13  ;;  %v2559_v7 = vld [vmem:[%s3503_s6 + $0x10] sm:$0xff] }
 0x72d   : > { %1537 = vmatpush.bf16.msrb.mxu3 %v2559_v7 }
 0x72e   : > { %v1334_v17 = vadd.f32 %v2665_v11, %v1329_v14 }
 0x730   : > { %v1340_v19 = vpack.c.bf16 %v1334_v17, %v1333_v16 }
 0x732   : > { %2417 = vmatmul.msk.bf16.vlgmr.msrb.gmra.mxu2 %vm697_vm1, %v1340_v19 }
 0x7b5   : > { %v1368_v25 = vpop.f32.mrf.mxu2 }
 0x7b6   : > { %v1369_v26 = vadd.f32 %v2666_v24, %v1368_v25  ;;  %v2668_v25 = vld [vmem:[%s3513_s16] ss:$0 sm:$0xff] }
 0x7b8   : > { %v1375_v27 = vmul.f32 0.044715, %v1369_v26  ;;  %v1373_v41 = vmul.f32 0.5, %v1369_v26 }
 0x7ba   : > { %v1377_v28 = vmul.f32 %v1375_v27, %v1369_v26 }
 0x7bc   : > { %v1379_v29 = vmul.f32 %v1377_v28, %v1369_v26 }
 0x7bd   : > { %v1370_v30 = vpop.f32.mrf.mxu2 }
 0x7be   : > { %v1381_v31 = vadd.f32 %v1379_v29, %v1369_v26  ;;  %v1371_v0 = vadd.f32 %v2666_v24, %v1370_v30  ;;  %v2669_v29 = vld [vmem:[%s3514_s17] ss:$0 sm:$0xff] }
 0x7c0   : > { %v1376_v32 = vmul.f32 0.044715, %v1371_v0  ;;  %v1383_v33 = vmul.f32 0.7978846, %v1381_v31  ;;  %v1374_v42 = vmul.f32 0.5, %v1371_v0 }
 0x7c2   : > { %v1378_v34 = vmul.f32 %v1376_v32, %v1371_v0  ;;  %2720 = vtanh.f32 %v1383_v33 }
 0x7c4   : > { %v1380_v35 = vmul.f32 %v1378_v34, %v1371_v0 }
 0x7c6   : > { %v1382_v36 = vadd.f32 %v1380_v35, %v1371_v0  ;;  %v2670_v35 = vld [vmem:[%s3504_s7 + $0x1] ss:$0 sm:$0xff] }
 0x7c8   : > { %v1384_v37 = vmul.f32 0.7978846, %v1382_v36  ;;  %v2721_v38 = vpop.eup %2720 }
 0x7c9   : > { %v1387_v39 = vadd.f32 1.0, %v2721_v38 }
 0x7ca   : > { %2722 = vtanh.f32 %v1384_v37 }
 0x7cb   : > { %v1389_v44 = vmul.f32 %v1387_v39, %v1373_v41 }
 0x7d0   : > { %v2723_v40 = vpop.eup %2722 }
 0x7d1   : > { %v1388_v43 = vadd.f32 1.0, %v2723_v40 }
 0x7d3   : > { %v1390_v62 = vmul.f32 %v1388_v43, %v1374_v42 }
 0x7d5   : > { %v1400_v57 = vpack.c.bf16 %v1390_v62, %v1389_v44 }
 0x7d7   : > { %2434 = vmatmul.msk.bf16.vlgmr.msrb.gmra.mxu0 %vm1428_vm8, %v1400_v57 }
 0x854   : > { %v1441_v46 = vpop.f32.mrf.mxu0 }
 0x855   : > { %v1442_v47 = vadd.f32 %v2667_v45, %v1441_v46 }
 0x857   : > { %v1446_v58 = vadd.f32 %v1442_v47, %v1333_v16 }
 0x859   : > { %v1450_v48 = vsel %vm697_vm1, %v1446_v58, 0.0 }
 0x85a   : > { %1451 = vadd.xlane.f32.xlu2 %v1450_v48 }
 0x85c   : > { %v1443_v49 = vpop.f32.mrf.mxu0 }
 0x85d   : > { %v1444_v50 = vadd.f32 %v2667_v45, %v1443_v49 }
 0x85f   : > { %v1447_v51 = vadd.f32 %v1444_v50, %v1334_v17 }
 0x861   : > { %v1453_v52 = vsel %vm701_vm2, %v1447_v51, 0.0 }
 0x862   : > { %1454 = vadd.xlane.f32.xlu2 %v1453_v52 }
 0x8cd   : > { %v1452_v53 = vpop.xlane.xlu2 %1451 }
 0x8ce   : > { %v1456_v54 = vmul.f32 %v1452_v53, %v3025_v18 }
 0x8d0   : > { %v1458_v55 = vsub.f32 %v1446_v58, %v1456_v54 }
 0x8d2   : > { %v1460_v56 = vmul.f32 %v1458_v55, %v1458_v55 }
 0x8d4   : > { %v1462_v59 = vsel %vm697_vm1, %v1460_v56, 0.0 }
 0x8d5   : > { %1463 = vadd.xlane.f32.xlu0 %v1462_v59  ;;  %v1455_v60 = vpop.xlane.xlu2 %1454 }
 0x8d6   : > { %v1457_v61 = vmul.f32 %v1455_v60, %v3025_v18 }
 0x8d8   : > { %v1459_v63 = vsub.f32 %v1447_v51, %v1457_v61 }
 0x8da   : > { %v1461_v1 = vmul.f32 %v1459_v63, %v1459_v63 }
 0x8dc   : > { %v1465_v2 = vsel %vm701_vm2, %v1461_v1, 0.0 }
 0x8dd   : > { %1466 = vadd.xlane.f32.xlu2 %v1465_v2 }
 0x948   : > { %v1464_v4 = vpop.xlane.xlu0 %1463 }
 0x949   : > { %v1468_v5 = vmul.f32 %v1464_v4, %v3025_v18 }
 0x94b   : > { %v1470_v6 = vadd.f32 1e-12, %v1468_v5 }
 0x94d   : > { %2724 = vrsqrt.f32 %v1470_v6  ;;  %vm1478_vm15 = vweird.f32 %v1470_v6 }
 0x950   : > { %v1467_v8 = vpop.xlane.xlu2 %1466 }
 0x951   : > { %v1469_v9 = vmul.f32 %v1467_v8, %v3025_v18 }
 0x953   : > { %v2725_v10 = vpop.eup %2724  ;;  %v1471_v11 = vadd.f32 1e-12, %v1469_v9 }
 0x954   : > { %v1473_v12 = vmul.f32 %v2725_v10, %v1470_v6  ;;  %vm1479_vm9 = vweird.f32 %v2725_v10 }
 0x955   : > { %2726 = vrsqrt.f32 %v1471_v11  ;;  %vm1480_vm3 = vmor %vm1478_vm15, %vm1479_vm9  ;;  %vm1488_vm5 = vweird.f32 %v1471_v11  ;;  %vm2259_vm9 = vcmask 253952  }
 0x956   : > { %v1474_v13 = vmul.f32 %v2725_v10, %v1473_v12 }
 0x958   : > { %v1475_v14 = vmul.f32 0.5, %v1474_v13 }
 0x95a   : > { %v1476_v16 = vsub.f32 1.5, %v1475_v14 }
 0x95b   : > { %v2727_v17 = vpop.eup %2726 }
 0x95c   : > { %v1477_v19 = vmul.f32 %v2725_v10, %v1476_v16  ;;  %v1483_v20 = vmul.f32 %v2727_v17, %v1471_v11  ;;  %vm1489_vm4 = vweird.f32 %v2727_v17 }
 0x95d   : > { %vm1490_vm6 = vmor %vm1488_vm5, %vm1489_vm4 }
 0x95e   : > { %v1484_v21 = vmul.f32 %v2727_v17, %v1483_v20  ;;  %v1481_v22 = vsel %vm1480_vm3, %v2725_v10, %v1477_v19 }
 0x95f   : > { %v1492_v26 = vmul.f32 %v1481_v22, %v1458_v55 }
 0x960   : > { %v1485_v23 = vmul.f32 0.5, %v1484_v21 }
 0x961   : > { %v1497_v30 = vmul.f32 %v2668_v25, %v1492_v26 }
 0x962   : > { %v1486_v24 = vsub.f32 1.5, %v1485_v23 }
 0x963   : > { %v3272_v32 = vadd.f32 %v2669_v29, %v1497_v30 }
 0x964   : > { %v1487_v27 = vmul.f32 %v2727_v17, %v1486_v24 }
 0x966   : > { %v1491_v28 = vsel %vm1490_vm6, %v2727_v17, %v1487_v27 }
 0x967   : > { %v1493_v31 = vmul.f32 %v1491_v28, %v1459_v63 }
 0x969   : > { %v1498_v0 = vmul.f32 %v2668_v25, %v1493_v31 }
 0x96b   : > { %v3274_v33 = vadd.f32 %v2669_v29, %v1498_v0 }
 0x96d   : > { %v1511_v34 = vpack.c.bf16 %v3274_v33, %v3272_v32 }
 0x96f   : > { %2448 = vmatmul.msk.bf16.vlgmr.msrb.gmra.mxu3 %vm697_vm1, %v1511_v34 }
 0x9f2   : > { %v1539_v36 = vpop.f32.mrf.mxu3 }
 0x9f3   : > { %v3282_v37 = vadd.f32 %v2670_v35, %v1539_v36 }
 0x9f5   : > { %1546 = vrot.lane.b32.xlu2 %v3282_v37, %s2838_s19 }
 0x9fa   : > { %v1541_v38 = vpop.f32.mrf.mxu3 }
 0x9fb   : > { %v3286_v39 = vadd.f32 %v2670_v35, %v1541_v38 }
 0x9fd   : > { %1649 = vrot.lane.b32.xlu0 %v3286_v39, %s2837_s21  ;;  %1548 = vrot.lane.b32.xlu1 %v3286_v39, %s2838_s19  ;;  %s3570_s19 = smov 112  }
 0x9fe   : > { %1748 = vrot.lane.b32.xlu2 %v3282_v37, %s2843_s28 }
 0xa05   : > { %1643 = vrot.lane.b32.xlu1 %v3282_v37, %s2841_s23  ;;  %1647 = vrot.lane.b32.xlu0 %v3282_v37, %s2837_s21  ;;  %s3572_s21 = smov 64  }
 0xa06   : > { %1645 = vrot.lane.b32.xlu2 %v3286_v39, %s2841_s23  ;;  %s3573_s23 = smov 48  }
 0xa0d   : > { %1851 = vrot.lane.b32.xlu1 %v3286_v39, %s3568_s24  ;;  %1750 = vrot.lane.b32.xlu0 %v3286_v39, %s2843_s28  ;;  %s3574_s28 = smov 40  }
 0xa0e   : > { %1845 = vrot.lane.b32.xlu2 %v3282_v37, %s3569_s25 }
 0xa15   : > { %1744 = vrot.lane.b32.xlu1 %v3282_v37, %s3570_s19  ;;  %1849 = vrot.lane.b32.xlu0 %v3282_v37, %s3568_s24 }
 0xa16   : > { %1710 = vrot.lane.b32.xlu2 %v3286_v39, %s3571_s4 }
 0xa1d   : > { %1847 = vrot.lane.b32.xlu1 %v3286_v39, %s3569_s25  ;;  %1746 = vrot.lane.b32.xlu0 %v3286_v39, %s3570_s19 }
 0xa25   : > { %1607 = vrot.lane.b32.xlu1 %v3282_v37, %s3572_s21  ;;  %1609 = vrot.lane.b32.xlu0 %v3286_v39, %s3572_s21  ;;  %s3578_s21 = sld [smem:[#allocation17_spill]] }
 0xa4f   : > { %v1547_v40 = vpop.permute.xlu2 %1546 }
 0xa58   : > { %v1749_v41 = vpop.permute.xlu2 %1748 }
 0xa60   : > { %v1646_v42 = vpop.permute.xlu2 %1645 }
 0xa68   : > { %v1846_v43 = vpop.permute.xlu2 %1845 }
 0xa6f   : > { %v1650_v44 = vpop.permute.xlu0 %1649  ;;  %v1549_v62 = vpop.permute.xlu1 %1548 }
 0xa70   : > { %v1711_v57 = vpop.permute.xlu2 %1710  ;;  %2449 = vmatpush.xpose.msk.msra.mxu1 %vm805_vm10, %v1549_v62  ;;  %2456 = vmatpush.xpose.msk.msra.mxu0 %vm805_vm10, %v1650_v44 }
 0xa71   : > { %2460 = vmatpush.msk.msra.mxu3 %vm879_vm13, %v1711_v57 }
 0xa74   : > { %2450 = vmatpush.xpose.msk.msra.mxu1 %vm805_vm10, %v1547_v40 }
 0xa77   : > { %v1644_v45 = vpop.permute.xlu1 %1643  ;;  %v1648_v46 = vpop.permute.xlu0 %1647  ;;  %2451 = vmatmul.msk.f32.vlgmr.msra.gmra.mxu1 %vm805_vm10, %v3282_v37 }
 0xa78   : > { %2457 = vmatpush.xpose.msk.msra.mxu0 %vm805_vm10, %v1648_v46 }
 0xa7b   : > { %2458 = vmatmul.msk.f32.vlgmr.msra.gmra.mxu0 %vm805_vm10, %v1644_v45 }
 0xa7f   : > { %v1852_v47 = vpop.permute.xlu1 %1851  ;;  %v1751_v58 = vpop.permute.xlu0 %1750  ;;  %2452 = vmatmul.msk.f32.gmra.mxu1 %vm805_vm10, %v3286_v39 }
 0xa80   : > { %2463 = vmatpush.xpose.msk.msrb.mxu1 %vm805_vm10, %v1751_v58  ;;  %2470 = vmatpush.xpose.msk.msrb.mxu0 %vm805_vm10, %v1852_v47 }
 0xa83   : > { %2459 = vmatmul.msk.f32.gmra.mxu0 %vm805_vm10, %v1646_v42 }
 0xa84   : > { %2464 = vmatpush.xpose.msk.msrb.mxu1 %vm805_vm10, %v1749_v41 }
 0xa87   : > { %v1745_v48 = vpop.permute.xlu1 %1744  ;;  %v1850_v49 = vpop.permute.xlu0 %1849 }
 0xa88   : > { %2465 = vmatmul.msk.f32.vlgmr.msrb.gmra.mxu1 %vm805_vm10, %v1745_v48  ;;  %2471 = vmatpush.xpose.msk.msrb.mxu0 %vm805_vm10, %v1850_v49 }
 0xa8b   : > { %2472 = vmatmul.msk.f32.vlgmr.msrb.gmra.mxu0 %vm805_vm10, %v1846_v43 }
 0xa8f   : > { %v1848_v50 = vpop.permute.xlu1 %1847  ;;  %v1747_v51 = vpop.permute.xlu0 %1746 }
 0xa90   : > { %2466 = vmatmul.msk.f32.gmra.mxu1 %vm805_vm10, %v1747_v51 }
 0xa93   : > { %2473 = vmatmul.msk.f32.gmra.mxu0 %vm805_vm10, %v1848_v50 }
 0xa97   : > { %v1610_v52 = vpop.permute.xlu0 %1609  ;;  %v1608_v53 = vpop.permute.xlu1 %1607 }
 0xa98   : > { %2453 = vmatpush.msk.msra.mxu2 %vm879_vm13, %v1610_v52 }
 0xa9a   : > { %1635 = vmatpush.msra.mxu2 %v1608_v53 }
 0xaf4   : > { %v1575_v54 = vpop.f32.mrf.mxu1 }
 0xaf5   : > { %v1581_v55 = vmul.f32 0.35355338, %v1575_v54 }
 0xaf7   : > { %v1583_v56 = vadd.f32 %v3112_v15, %v1581_v55 }
 0xaf8   : > { %v1676_v59 = vpop.f32.mrf.mxu0 }
 0xaf9   : > { %v1682_v60 = vmul.f32 0.35355338, %v1676_v59  ;;  %v1585_v61 = vsel %vm844_vm11, %v1583_v56, -inf }
 0xafa   : > { %1586 = vmax.xlane.f32.xlu2 %v1585_v61 }
 0xafb   : > { %v1684_v63 = vadd.f32 %v3112_v15, %v1682_v60 }
 0xafc   : > { %v1578_v1 = vpop.f32.mrf.mxu1 }
 0xafd   : > { %v1582_v2 = vmul.f32 0.35355338, %v1578_v1  ;;  %v1686_v3 = vsel %vm844_vm11, %v1684_v63, -inf }
 0xafe   : > { %1687 = vmax.xlane.f32.xlu0 %v1686_v3 }
 0xaff   : > { %v1584_v4 = vadd.f32 %v3112_v15, %v1582_v2 }
 0xb00   : > { %v1679_v5 = vpop.f32.mrf.mxu0 }
 0xb01   : > { %v1683_v6 = vmul.f32 0.35355338, %v1679_v5  ;;  %v1588_v7 = vsel %vm848_vm12, %v1584_v4, -inf }
 0xb02   : > { %1589 = vmax.xlane.f32.xlu1 %v1588_v7 }
 0xb03   : > { %v1685_v8 = vadd.f32 %v3112_v15, %v1683_v6 }
 0xb05   : > { %v1777_v9 = vpop.f32.mrf.mxu1  ;;  %v1689_v10 = vsel %vm848_vm12, %v1685_v8, -inf }
 0xb06   : > { %v1783_v11 = vmul.f32 0.35355338, %v1777_v9  ;;  %1690 = vmax.xlane.f32.xlu2 %v1689_v10 }
 0xb08   : > { %v1878_v12 = vpop.f32.mrf.mxu0  ;;  %v1785_v13 = vadd.f32 %v3112_v15, %v1783_v11 }
 0xb09   : > { %v1884_v14 = vmul.f32 0.35355338, %v1878_v12 }
 0xb0a   : > { %v1787_v16 = vsel %vm844_vm11, %v1785_v13, -inf }
 0xb0b   : > { %1788 = vmax.xlane.f32.xlu0 %v1787_v16  ;;  %v1886_v17 = vadd.f32 %v3112_v15, %v1884_v14 }
 0xb0d   : > { %v1780_v19 = vpop.f32.mrf.mxu1  ;;  %v1888_v20 = vsel %vm844_vm11, %v1886_v17, -inf }
 0xb0e   : > { %v1784_v21 = vmul.f32 0.35355338, %v1780_v19  ;;  %1889 = vmax.xlane.f32.xlu1 %v1888_v20 }
 0xb10   : > { %v1786_v22 = vadd.f32 %v3112_v15, %v1784_v21  ;;  %v1881_v24 = vpop.f32.mrf.mxu0 }
 0xb11   : > { %v1885_v25 = vmul.f32 0.35355338, %v1881_v24 }
 0xb12   : > { %v1790_v23 = vsel %vm848_vm12, %v1786_v22, -inf }
 0xb13   : > { %1791 = vmax.xlane.f32.xlu2 %v1790_v23  ;;  %v1887_v26 = vadd.f32 %v3112_v15, %v1885_v25 }
 0xb15   : > { %v1891_v27 = vsel %vm848_vm12, %v1887_v26, -inf }
 0xb1f   : > { %1811 = vrot.lane.b32.xlu0 %v3286_v39, %s3573_s23 }
 0xb2b   : > { %1708 = vrot.lane.b32.xlu2 %v3282_v37, %s3571_s4 }
 0xb49   : > { %1892 = vmax.xlane.f32.xlu0 %v1891_v27 }
 0xb6d   : > { %v1587_v28 = vpop.xlane.xlu2 %1586 }
 0xb6e   : > { %v1591_v29 = vsub.f32 %v1583_v56, %v1587_v28 }
 0xb70   : > { %v1593_v30 = vmul.f32 1.442695, %v1591_v29 }
 0xb71   : > { %v1688_v31 = vpop.xlane.xlu0 %1687 }
 0xb72   : > { %2728 = vpow2.f32 %v1593_v30  ;;  %v1692_v0 = vsub.f32 %v1684_v63, %v1688_v31 }
 0xb74   : > { %v1694_v34 = vmul.f32 1.442695, %v1692_v0 }
 0xb75   : > { %v1590_v35 = vpop.xlane.xlu1 %1589 }
 0xb76   : > { %2730 = vpow2.f32 %v1694_v34  ;;  %v1592_v36 = vsub.f32 %v1584_v4, %v1590_v35 }
 0xb78   : > { %v2729_v38 = vpop.eup %2728  ;;  %v1595_v40 = vmul.f32 1.442695, %v1592_v36 }
 0xb79   : > { %v1691_v41 = vpop.xlane.xlu2 %1690  ;;  %v1597_v42 = vsel %vm844_vm11, %v2729_v38, 0.0 }
 0xb7a   : > { %2732 = vpow2.f32 %v1595_v40  ;;  %v1693_v15 = vsub.f32 %v1685_v8, %v1691_v41  ;;  %1598 = vadd.xlane.f32.xlu1 %v1597_v42 }
 0xb7c   : > { %v2731_v43 = vpop.eup %2730  ;;  %v1696_v44 = vmul.f32 1.442695, %v1693_v15 }
 0xb7d   : > { %v1698_v62 = vsel %vm844_vm11, %v2731_v43, 0.0 }
 0xb7e   : > { %2734 = vpow2.f32 %v1696_v44  ;;  %v1789_v57 = vpop.xlane.xlu0 %1788  ;;  %1699 = vadd.xlane.f32.xlu2 %v1698_v62 }
 0xb7f   : > { %v1793_v45 = vsub.f32 %v1785_v13, %v1789_v57 }
 0xb80   : > { %v2733_v46 = vpop.eup %2732 }
 0xb81   : > { %v1795_v47 = vmul.f32 1.442695, %v1793_v45  ;;  %v1890_v58 = vpop.xlane.xlu1 %1889  ;;  %v1600_v48 = vsel %vm848_vm12, %v2733_v46, 0.0 }
 0xb82   : > { %v1894_v49 = vsub.f32 %v1886_v17, %v1890_v58  ;;  %1601 = vadd.xlane.f32.xlu1 %v1600_v48  ;;  %v2561_v58 = vld [vmem:[%s3505_s8 + $0x10] sm:$0xff] }
 0xb83   : > { %2736 = vpow2.f32 %v1795_v47  ;;  %v2562_v47 = vld [vmem:[%s3505_s8 + $0x18] sm:$0xff] }
 0xb84   : > { %v2735_v50 = vpop.eup %2734  ;;  %v1896_v51 = vmul.f32 1.442695, %v1894_v49  ;;  %2008 = vmatpush.bf16.msra.mxu1 %v2562_v47 }
 0xb85   : > { %v1701_v52 = vsel %vm848_vm12, %v2735_v50, 0.0 }
 0xb86   : > { %2738 = vpow2.f32 %v1896_v51  ;;  %1702 = vadd.xlane.f32.xlu0 %v1701_v52  ;;  %v1792_v53 = vpop.xlane.xlu2 %1791 }
 0xb87   : > { %v1794_v54 = vsub.f32 %v1786_v22, %v1792_v53 }
 0xb88   : > { %2009 = vmatpush.bf16.msra.mxu1 %v2561_v58 }
 0xb89   : > { %v2737_v55 = vpop.eup %2736  ;;  %v1797_v56 = vmul.f32 1.442695, %v1794_v54 }
 0xb8a   : > { %v1799_v59 = vsel %vm844_vm11, %v2737_v55, 0.0 }
 0xb8b   : > { %2740 = vpow2.f32 %v1797_v56  ;;  %1800 = vadd.xlane.f32.xlu2 %v1799_v59 }
 0xb8c   : > { %v2739_v60 = vpop.eup %2738 }
 0xb8d   : > { %v1900_v61 = vsel %vm844_vm11, %v2739_v60, 0.0 }
 0xb8e   : > { %1901 = vadd.xlane.f32.xlu1 %v1900_v61  ;;  %v1709_v63 = vpop.permute.xlu2 %1708 }
 0xb8f   : > { %1736 = vmatpush.msra.mxu3 %v1709_v63 }
 0xb91   : > { %v2741_v1 = vpop.eup %2740  ;;  %v1812_v2 = vpop.permute.xlu0 %1811 }
 0xb92   : > { %2467 = vmatpush.msk.msrb.mxu2 %vm879_vm13, %v1812_v2  ;;  %v1802_v3 = vsel %vm848_vm12, %v2741_v1, 0.0 }
 0xb93   : > { %1803 = vadd.xlane.f32.xlu2 %v1802_v3 }
 0xb9a   : > { %1809 = vrot.lane.b32.xlu0 %v3282_v37, %s3573_s23  ;;  %s646_s23 = sand.u32 1, %s2826_s22  }
 0xb9b   : > { %s647_s27 = scalar_lea.vmem [#allocation2], %s646_s23  ;;  %s2262_s24 = scalar_lea.sflag [#allocation3], %s646_s23 }
 0xb9c   : > { %s2272_s20 = sshll.u32 %s647_s27, 4  ;;  %s2273_s20 = int_to_ptr.vmem [resolvable:$true] %s2272_s20 }
 0xba2   : > { %1910 = vrot.lane.b32.xlu0 %v3282_v37, %s3574_s28 }
 0xba7   : > { %1912 = vrot.lane.b32.xlu1 %v3286_v39, %s3574_s28 }
 0xbbc   : > { %v1893_v4 = vpop.xlane.xlu0 %1892 }
 0xbbd   : > { %v1895_v5 = vsub.f32 %v1887_v26, %v1893_v4  ;;  %v2671_v4 = vld [vmem:[%s3506_s9 + $0x1] ss:$0 sm:$0xff] }
 0xbbf   : > { %v1898_v6 = vmul.f32 1.442695, %v1895_v5 }
 0xbc1   : > { %2742 = vpow2.f32 %v1898_v6 }
 0xbc7   : > { %v2743_v7 = vpop.eup %2742 }
 0xbc8   : > { %v1903_v8 = vsel %vm848_vm12, %v2743_v7, 0.0 }
 0xbc9   : > { %1904 = vadd.xlane.f32.xlu2 %v1903_v8 }
 0xbed   : > { %v1599_v9 = vpop.xlane.xlu1 %1598 }
 0xbee   : > { %2744 = vrcp.f32 %v1599_v9 }
 0xbf1   : > { %v1700_v10 = vpop.xlane.xlu2 %1699 }
 0xbf2   : > { %2746 = vrcp.f32 %v1700_v10 }
 0xbf4   : > { %v2745_v11 = vpop.eup %2744 }
 0xbf5   : > { %v1605_v12 = vmul.f32 %v2745_v11, %v2729_v38  ;;  %v1602_v13 = vpop.xlane.xlu1 %1601 }
 0xbf6   : > { %2748 = vrcp.f32 %v1602_v13 }
 0xbf7   : > { %2454 = vmatmul.msk.f32.vlgmr.msra.gmra.mxu2 %vm844_vm11, %v1605_v12 }
 0xbf8   : > { %v2747_v37 = vpop.eup %2746 }
 0xbf9   : > { %v1706_v39 = vmul.f32 %v2747_v37, %v2731_v43  ;;  %v1703_v14 = vpop.xlane.xlu0 %1702 }
 0xbfa   : > { %2750 = vrcp.f32 %v1703_v14 }
 0xbfb   : > { %2461 = vmatmul.msk.f32.vlgmr.msra.gmra.mxu3 %vm844_vm11, %v1706_v39 }
 0xbfc   : > { %v2749_v16 = vpop.eup %2748 }
 0xbfd   : > { %v1606_v17 = vmul.f32 %v2749_v16, %v2733_v46 }
 0xbfe   : > { %v1801_v19 = vpop.xlane.xlu2 %1800 }
 0xbff   : > { %2455 = vmatmul.msk.f32.gmra.mxu2 %vm844_vm11, %v1606_v17  ;;  %2752 = vrcp.f32 %v1801_v19 }
 0xc00   : > { %v2751_v20 = vpop.eup %2750 }
 0xc01   : > { %v1707_v21 = vmul.f32 %v2751_v20, %v2735_v50  ;;  %v1902_v26 = vpop.xlane.xlu1 %1901 }
 0xc03   : > { %2462 = vmatmul.msk.f32.gmra.mxu3 %vm844_vm11, %v1707_v21 }
 0xc05   : > { %v2753_v23 = vpop.eup %2752 }
 0xc06   : > { %v1804_v22 = vpop.xlane.xlu2 %1803  ;;  %v1807_v24 = vmul.f32 %v2753_v23, %v2737_v55 }
 0xc07   : > { %2754 = vrcp.f32 %v1804_v22 }
 0xc08   : > { %2756 = vrcp.f32 %v1902_v26 }
 0xc0c   : > { %v1810_v25 = vpop.permute.xlu0 %1809 }
 0xc0d   : > { %1837 = vmatpush.msrb.mxu2 %v1810_v25  ;;  %v2755_v27 = vpop.eup %2754  ;;  %v2563_v25 = vld [vmem:[%s3509_s12 + $0x10] sm:$0xff] }
 0xc0e   : > { %2468 = vmatmul.msk.f32.vlgmr.msrb.gmra.mxu2 %vm844_vm11, %v1807_v24  ;;  %v1808_v28 = vmul.f32 %v2755_v27, %v2741_v1  ;;  %v2757_v29 = vpop.eup %2756 }
 0xc0f   : > { %v1908_v31 = vmul.f32 %v2757_v29, %v2739_v60 }
 0xc14   : > { %v1911_v0 = vpop.permute.xlu0 %1910 }
 0xc16   : > { %2469 = vmatmul.msk.f32.gmra.mxu2 %vm844_vm11, %v1808_v28 }
 0xc19   : > { %v1913_v30 = vpop.permute.xlu1 %1912 }
 0xc1a   : > { %2474 = vmatpush.msk.msrb.mxu3 %vm879_vm13, %v1913_v30 }
 0xc1c   : > { %1938 = vmatpush.msrb.mxu3 %v1911_v0 }
 0xc1d   : > { %2475 = vmatmul.msk.f32.vlgmr.msrb.gmra.mxu3 %vm844_vm11, %v1908_v31 }
 0xc3c   : > { %v1905_v34 = vpop.xlane.xlu2 %1904 }
 0xc3d   : > { %2758 = vrcp.f32 %v1905_v34 }
 0xc43   : > { %v2759_v35 = vpop.eup %2758 }
 0xc44   : > { %v1909_v36 = vmul.f32 %v2759_v35, %v2743_v7 }
 0xc46   : > { %2476 = vmatmul.msk.f32.gmra.mxu3 %vm844_vm11, %v1909_v36 }
 0xc7a   : > { %v1637_v40 = vpop.f32.mrf.mxu2 }
 0xc7e   : > { %v1738_v38 = vpop.f32.mrf.mxu3 }
 0xc82   : > { %v1640_v15 = vpop.f32.mrf.mxu2 }
 0xc86   : > { %v1741_v41 = vpop.f32.mrf.mxu3 }
 0xc87   : > { %v2644_v42 = vpack.i.bf16 %v1741_v41, %v1738_v38 }
 0xc89   : > { %2645 = vrot.lane.b32.xlu2 %v2644_v42, %s3575_s26 }
 0xc91   : > { %v1839_v43 = vpop.f32.mrf.mxu2 }
 0xc99   : > { %v1842_v44 = vpop.f32.mrf.mxu2 }
 0xc9a   : > { %v2649_v62 = vpack.i.bf16 %v1842_v44, %v1839_v43  ;;  %v2672_v43 = vld [vmem:[%s3507_s10 + $0x1] ss:$0 sm:$0xff] }
 0xc9c   : > { %2650 = vrot.lane.b32.xlu0 %v2649_v62, %s3576_s30  ;;  %s3579_s30 = sld [smem:[#allocation18_spill]] }
 0xca0   : > { %v1940_v57 = vpop.f32.mrf.mxu3 }
 0xcc9   : > { %v1943_v45 = vpop.f32.mrf.mxu3 }
 0xcca   : > { %v2654_v46 = vpack.i.bf16 %v1943_v45, %v1940_v57  ;;  %v2673_v45 = vld [vmem:[%s3508_s11 + $0x1] ss:$0 sm:$0xff] }
 0xccc   : > { %2655 = vrot.lane.b32.xlu1 %v2654_v46, %s3577_s0  ;;  %s2270_s0 = scalar_lea.hbm %s3579_s30, %s2977_s2 }
 0xccd   : > { %s2274_s1 = sshll.u32 %s2270_s0, 4  ;;  %s2275_s1 = int_to_ptr.hbm [resolvable:$true] %s2274_s1 }
 0xcce   : > { %s2786_s25 = sshra.s32 %s2275_s1, 4  ;;  %s2787_s25 = int_to_ptr.hbm [resolvable:$true] %s2786_s25 }
 0xccf   : > { %s2788_s19 = scalar_lea.hbm %s2787_s25, 1  ;;  %p2793_p0 = scmp.lt.s32.totalorder %s2787_s25, %s3579_s30 }
 0xcd0   : > { %p2789_p11 = scmp.ne.s32.totalorder %s2787_s25, %s2788_s19 }
 0xcd2   : > { %p2790_p12 = pnand %p2789_p11, %p2994_p5 }
 0xcd4   : > { %p2791_p13 = pneg %p2790_p12 }
 0xce3   : > { %v2646_v48 = vpop.permute.xlu2 %2645 }
 0xce4   : > { %v2648_v50 = vunpack.i.h.bf16 %v2646_v48  ;;  %v2647_v51 = vunpack.i.l.bf16 %v2646_v48 }
 0xce6   : > { %v1971_v55 = vsel %vm805_vm10, %v1640_v15, %v2648_v50  ;;  %v1970_v56 = vsel %vm805_vm10, %v1637_v40, %v2647_v51  ;;  %v2568_v51 = vld [vmem:[%s3511_s14 + $0x38] sm:$0xff] }
 0xce7   : > { %2180 = vmatpush.bf16.msra.mxu0 %v2568_v51 }
 0xd0e   : > { %v2651_v49 = vpop.permute.xlu0 %2650 }
 0xd0f   : > { %v2653_v52 = vunpack.i.h.bf16 %v2651_v49  ;;  %v2652_v53 = vunpack.i.l.bf16 %v2651_v49 }
 0xd11   : > { %v1972_v61 = vsel %vm675_vm0, %v1970_v56, %v2652_v53  ;;  %v1973_v63 = vsel %vm675_vm0, %v1971_v55, %v2653_v52  ;;  %v2567_v52 = vld [vmem:[%s3511_s14 + $0x30] sm:$0xff]  ;;  %v2566_v53 = vld [vmem:[%s3511_s14 + $0x28] sm:$0xff]  ;;  %v2674_v55 = vld [vmem:[%s3510_s13 + $0x1] ss:$0 sm:$0xff] }
 0xd12   : > { %2181 = vmatpush.bf16.msra.mxu0 %v2567_v52 }
 0xd16   : > { %2182 = vmatpush.bf16.msra.mxu0 %v2566_v53 }
 0xd3e   : > { %v2656_v54 = vpop.permute.xlu1 %2655 }
 0xd3f   : > { %v2658_v59 = vunpack.i.h.bf16 %v2656_v54  ;;  %v2657_v60 = vunpack.i.l.bf16 %v2656_v54  ;;  %v2565_v54 = vld [vmem:[%s3511_s14 + $0x20] sm:$0xff] }
 0xd40   : > { %2183 = vmatpush.bf16.msra.mxu0 %v2565_v54 }
 0xd41   : > { %v1974_v1 = vsel %vm1236_vm14, %v1972_v61, %v2657_v60  ;;  %v1975_v2 = vsel %vm1236_vm14, %v1973_v63, %v2658_v59 }
 0xd42   : > { %v1983_v3 = vpack.c.bf16 %v1975_v2, %v1974_v1 }
 0xd44   : > { %2490 = vmatmul.msk.bf16.vlgmr.msra.gmra.mxu1 %vm697_vm1, %v1983_v3 }
 0xdc1   : > { %v2011_v5 = vpop.f32.mrf.mxu1 }
 0xdc2   : > { %v2012_v6 = vadd.f32 %v2671_v4, %v2011_v5 }
 0xdc4   : > { %v2016_v7 = vadd.f32 %v2012_v6, %v3272_v32 }
 0xdc6   : > { %v2022_v8 = vsel %vm697_vm1, %v2016_v7, 0.0 }
 0xdc7   : > { %2023 = vadd.xlane.f32.xlu0 %v2022_v8 }
 0xdc9   : > { %v2013_v9 = vpop.f32.mrf.mxu1 }
 0xdca   : > { %v2014_v10 = vadd.f32 %v2671_v4, %v2013_v9 }
 0xdcc   : > { %v2017_v11 = vadd.f32 %v2014_v10, %v3274_v33  ;;  %v2564_v33 = vld [vmem:[%s3509_s12 + $0x18] sm:$0xff] }
 0xdcd   : > { %2108 = vmatpush.bf16.msra.mxu2 %v2564_v33 }
 0xdce   : > { %v2025_v12 = vsel %vm701_vm2, %v2017_v11, 0.0 }
 0xdcf   : > { %2026 = vadd.xlane.f32.xlu1 %v2025_v12 }
 0xdd1   : > { %2109 = vmatpush.bf16.msra.mxu2 %v2563_v25 }
 0xe3a   : > { %v2024_v13 = vpop.xlane.xlu0 %2023 }
 0xe3b   : > { %v2028_v37 = vmul.f32 %v2024_v13, %v3025_v18 }
 0xe3d   : > { %v2030_v39 = vsub.f32 %v2016_v7, %v2028_v37 }
 0xe3f   : > { %v2032_v14 = vmul.f32 %v2030_v39, %v2030_v39 }
 0xe41   : > { %v2034_v16 = vsel %vm697_vm1, %v2032_v14, 0.0 }
 0xe42   : > { %v2027_v17 = vpop.xlane.xlu1 %2026  ;;  %2035 = vadd.xlane.f32.xlu2 %v2034_v16 }
 0xe43   : > { %v2029_v32 = vmul.f32 %v2027_v17, %v3025_v18 }
 0xe45   : > { %v2031_v19 = vsub.f32 %v2017_v11, %v2029_v32  ;;  %v2675_v32 = vld [vmem:[%s3512_s15 + $0x1] ss:$0 sm:$0xff] }
 0xe47   : > { %v2033_v20 = vmul.f32 %v2031_v19, %v2031_v19 }
 0xe49   : > { %v2037_v21 = vsel %vm701_vm2, %v2033_v20, 0.0 }
 0xe4a   : > { %2038 = vadd.xlane.f32.xlu0 %v2037_v21 }
 0xeb5   : > { %v2036_v22 = vpop.xlane.xlu2 %2035 }
 0xeb6   : > { %v2040_v23 = vmul.f32 %v2036_v22, %v3025_v18 }
 0xeb8   : > { %v2042_v24 = vadd.f32 1e-12, %v2040_v23 }
 0xeba   : > { %2760 = vrsqrt.f32 %v2042_v24  ;;  %vm2050_vm2 = vweird.f32 %v2042_v24 }
 0xebd   : > { %v2039_v26 = vpop.xlane.xlu0 %2038 }
 0xebe   : > { %v2041_v27 = vmul.f32 %v2039_v26, %v3025_v18 }
 0xec0   : > { %v2761_v28 = vpop.eup %2760  ;;  %v2043_v29 = vadd.f32 1e-12, %v2041_v27 }
 0xec1   : > { %v2045_v30 = vmul.f32 %v2761_v28, %v2042_v24  ;;  %vm2051_vm0 = vweird.f32 %v2761_v28 }
 0xec2   : > { %2762 = vrsqrt.f32 %v2043_v29  ;;  %vm2052_vm10 = vmor %vm2050_vm2, %vm2051_vm0  ;;  %vm2060_vm12 = vweird.f32 %v2043_v29 }
 0xec3   : > { %v2046_v31 = vmul.f32 %v2761_v28, %v2045_v30 }
 0xec5   : > { %v2047_v0 = vmul.f32 0.5, %v2046_v31 }
 0xec7   : > { %v2048_v34 = vsub.f32 1.5, %v2047_v0 }
 0xec8   : > { %v2763_v35 = vpop.eup %2762 }
 0xec9   : > { %v2049_v36 = vmul.f32 %v2761_v28, %v2048_v34  ;;  %v2055_v38 = vmul.f32 %v2763_v35, %v2043_v29  ;;  %vm2061_vm11 = vweird.f32 %v2763_v35  ;;  %v2569_v29 = vld [vmem:[%s3515_s18] sm:$0xff] }
 0xeca   : > { %vm2062_vm13 = vmor %vm2060_vm12, %vm2061_vm11 }
 0xecb   : > { %v2056_v40 = vmul.f32 %v2763_v35, %v2055_v38  ;;  %v2053_v41 = vsel %vm2052_vm10, %v2761_v28, %v2049_v36  ;;  %v2570_v28 = vld [vmem:[%s3515_s18 + $0x8] sm:$0xff] }
 0xecc   : > { %v2064_v44 = vmul.f32 %v2053_v41, %v2030_v39  ;;  %2251 = vmatpush.bf16.msra.mxu3 %v2570_v28 }
 0xecd   : > { %v2057_v42 = vmul.f32 0.5, %v2056_v40 }
 0xece   : > { %v2069_v46 = vmul.f32 %v2672_v43, %v2064_v44 }
 0xecf   : > { %v2058_v15 = vsub.f32 1.5, %v2057_v42  ;;  %v2676_v42 = vld [vmem:[%s3513_s16 + $0x1] ss:$0 sm:$0xff] }
 0xed0   : > { %v2074_v48 = vadd.f32 %v2673_v45, %v2069_v46  ;;  %2252 = vmatpush.bf16.msra.mxu3 %v2569_v29 }
 0xed1   : > { %v2059_v62 = vmul.f32 %v2763_v35, %v2058_v15 }
 0xed3   : > { %v2063_v57 = vsel %vm2062_vm13, %v2763_v35, %v2059_v62 }
 0xed4   : > { %v2065_v47 = vmul.f32 %v2063_v57, %v2031_v19 }
 0xed6   : > { %v2070_v58 = vmul.f32 %v2672_v43, %v2065_v47 }
 0xed8   : > { %v2075_v49 = vadd.f32 %v2673_v45, %v2070_v58  ;;  %v2229_v45 = vld [vmem:[%s3578_s21] sm:$0x1]  ;;  %s2792_s21 = scalar_lea.hbm %s3579_s30, 2 }
 0xed9   : > { %p2794_p1 = scmp.lt.s32.totalorder %s2792_s21, %s2788_s19 }
 0xeda   : > { %v2083_v50 = vpack.c.bf16 %v2075_v49, %v2074_v48 }
 0xedb   : > { %p2795_p2 = por %p2794_p1, %p2793_p0 }
 0xedc   : > { %2506 = vmatmul.msk.bf16.vlgmr.msra.gmra.mxu2 %vm697_vm1, %v2083_v50 }
 0xedd   : > { %p2796_p3 = pnand %p2795_p2, %p2791_p13 }
 0xf5f   : > { %v2111_v56 = vpop.f32.mrf.mxu2 }
 0xf60   : > { %v2112_v59 = vadd.f32 %v2674_v55, %v2111_v56 }
 0xf62   : > { %v2118_v60 = vmul.f32 0.044715, %v2112_v59  ;;  %v2116_v13 = vmul.f32 0.5, %v2112_v59 }
 0xf64   : > { %v2120_v61 = vmul.f32 %v2118_v60, %v2112_v59 }
 0xf66   : > { %v2122_v63 = vmul.f32 %v2120_v61, %v2112_v59 }
 0xf67   : > { %v2113_v1 = vpop.f32.mrf.mxu2 }
 0xf68   : > { %v2124_v2 = vadd.f32 %v2122_v63, %v2112_v59  ;;  %v2114_v3 = vadd.f32 %v2674_v55, %v2113_v1 }
 0xf6a   : > { %v2119_v4 = vmul.f32 0.044715, %v2114_v3  ;;  %v2126_v5 = vmul.f32 0.7978846, %v2124_v2  ;;  %v2117_v37 = vmul.f32 0.5, %v2114_v3 }
 0xf6c   : > { %v2121_v6 = vmul.f32 %v2119_v4, %v2114_v3  ;;  %2764 = vtanh.f32 %v2126_v5 }
 0xf6e   : > { %v2123_v7 = vmul.f32 %v2121_v6, %v2114_v3 }
 0xf70   : > { %v2125_v8 = vadd.f32 %v2123_v7, %v2114_v3 }
 0xf72   : > { %v2127_v9 = vmul.f32 0.7978846, %v2125_v8  ;;  %v2765_v10 = vpop.eup %2764 }
 0xf73   : > { %v2130_v11 = vadd.f32 1.0, %v2765_v10 }
 0xf74   : > { %2766 = vtanh.f32 %v2127_v9 }
 0xf75   : > { %v2132_v14 = vmul.f32 %v2130_v11, %v2116_v13 }
 0xf7a   : > { %v2767_v12 = vpop.eup %2766 }
 0xf7b   : > { %v2131_v39 = vadd.f32 1.0, %v2767_v12 }
 0xf7d   : > { %v2133_v16 = vmul.f32 %v2131_v39, %v2117_v37 }
 0xf7f   : > { %v2145_v17 = vpack.c.bf16 %v2133_v16, %v2132_v14 }
 0xf81   : > { %2532 = vmatmul.msk.bf16.vlgmr.msra.gmra.mxu0 %vm1428_vm8, %v2145_v17 }
 0xffe   : > { %v2185_v19 = vpop.f32.mrf.mxu0 }
 0xfff   : > { %v2186_v20 = vadd.f32 %v2675_v32, %v2185_v19 }
0x1001   : > { %v2189_v21 = vadd.f32 %v2186_v20, %v2074_v48 }
0x1003   : > { %v2194_v33 = vsel %vm697_vm1, %v2189_v21, 0.0 }
0x1004   : > { %2195 = vadd.xlane.f32.xlu1 %v2194_v33 }
0x1006   : > { %v2187_v22 = vpop.f32.mrf.mxu0 }
0x1077   : > { %v2196_v23 = vpop.xlane.xlu1 %2195 }
0x1078   : > { %v2197_v24 = vmul.f32 %v2196_v23, %v3025_v18 }
0x107a   : > { %v2198_v25 = vsub.f32 %v2189_v21, %v2197_v24 }
0x107c   : > { %v2199_v26 = vmul.f32 %v2198_v25, %v2198_v25 }
0x107e   : > { %v2200_v27 = vsel %vm697_vm1, %v2199_v26, 0.0 }
0x107f   : > { %2201 = vadd.xlane.f32.xlu0 %v2200_v27 }
0x10f2   : > { %v2202_v30 = vpop.xlane.xlu0 %2201 }
0x10f3   : > { %v2203_v31 = vmul.f32 %v2202_v30, %v3025_v18  ;;  %v2677_v18 = vld [vmem:[%s3514_s17 + $0x1] ss:$0 sm:$0xff] }
0x10f5   : > { %v2204_v0 = vadd.f32 1e-12, %v2203_v31 }
0x10f7   : > { %2768 = vrsqrt.f32 %v2204_v0  ;;  %vm2211_vm7 = vweird.f32 %v2204_v0 }
0x10fd   : > { %v2769_v34 = vpop.eup %2768 }
0x10fe   : > { %v2206_v35 = vmul.f32 %v2769_v34, %v2204_v0  ;;  %vm2212_vm14 = vweird.f32 %v2769_v34 }
0x10ff   : > { %vm2213_vm8 = vmor %vm2211_vm7, %vm2212_vm14 }
0x1100   : > { %v2207_v36 = vmul.f32 %v2769_v34, %v2206_v35 }
0x1102   : > { %v2208_v38 = vmul.f32 0.5, %v2207_v36 }
0x1104   : > { %v2209_v40 = vsub.f32 1.5, %v2208_v38 }
0x1106   : > { %v2210_v41 = vmul.f32 %v2769_v34, %v2209_v40 }
0x1108   : > { %v2214_v15 = vsel %vm2213_vm8, %v2769_v34, %v2210_v41 }
0x1109   : > { %v2215_v43 = vmul.f32 %v2214_v15, %v2198_v25 }
0x110b   : > { %v2219_v44 = vmul.f32 %v2676_v42, %v2215_v43 }
0x110d   : > { %v2223_v62 = vadd.f32 %v2677_v18, %v2219_v44 }
0x110f   : > { %v2224_v57 = vpack.c.bf16 %v2223_v62, %v2223_v62 }
0x1111   : > { %2543 = vmatmul.msk.bf16.vlgmr.msra.gmra.mxu3 %vm697_vm1, %v2224_v57 }
0x1194   : > { %v2254_v46 = vpop.f32.mrf.mxu3 }
0x1195   : > { %v2255_v47 = vadd.f32 %v2254_v46, %v2229_v45 }
0x1197   : > { %2770 = vtanh.f32 %v2255_v47 }
0x119c   : > { %v2256_v58 = vpop.f32.mrf.mxu3 }
0x119d   : > { %v2771_v48 = vpop.eup %2770 }
0x119e   : > { %2260 = vst.msk [vmem:[%s647_s27] sm:$0x1] %vm2259_vm9, %v2771_v48 }
0x119f   : > { %2799 = shalt.err (!%p2796_p3)
}
0x11a0   : > { %2575 = dma.vmem_to_hbm [thread:$0]  (%p2994_p5), %s2273_s20, 16, %s2275_s1, %s2262_s24  }
0x11a1 PF: > { %s3581_s23 = sld [smem:[#allocation7_spill]] }
0x11a2   : > { %s3582_s0 = sld [smem:[#allocation5_spill]] }
0x11a7   : > { %p2581_p4 = scmp.ge.s32.totalorder %s3581_s23, 2 }
0x11a8   : > { %s2286_s3 = sand.u32 1, %s3582_s0  }
0x11a9   : > { %p2578_p7 = pnand %p2581_p4, %p2998_p6  ;;  %s2287_s2 = scalar_lea.sflag [#allocation3], %s2286_s3 }
0x11ab   : > { %p2579_p8 = pneg %p2578_p7 }
0x11ad   : > { %2817 = dma.done.wait (%p2579_p8), %s2287_s2, 16  }
0x11ae   : > { %2819 = vsyncadd (%p2579_p8), %s2287_s2, 4294967280  ;;  %s3584_s24 = sld [smem:[#allocation8_spill]]  ;;  %s3587_s1 = smov %s2826_s22 }
0x11af   : > { %s3585_s25 = sld [smem:[#allocation6_spill]] }
0x11b0   : > { %s3586_s23 = sld [smem:[#allocation9_spill]] }
0x11b4   : > { %p30_p9 = scmp.ge.s32.totalorder %s3584_s24, 4  }
0x11b5   : > { %s3588_s22 = smov %s3585_s25 }
0x11b6   :  { %32 = sbr.rel (!%p30_p9) target bundleno = 11 (0xb), region = 153 }
0x11bb   :  { %2292 = vsyncpa [#allocation3], 1 }
0x11bc   :  { %2294 = vsyncpa [#allocation3 + $0x1], 1 }

</bundles_post_ra>
